<compile_context>
chip_gen: v6e
topology: v6e:2x2x1
jax: 0.10.0
libtpu: 0.0.40
codegen_flags: <defaults>
</compile_context>

<pallas_src>
import jax
import jax.numpy as jnp
from jax.experimental import pallas as pl
from jax.experimental.pallas import tpu as pltpu


# ----------------------------- fused GN kernel ------------------------------

def _gn_fused_kernel(
    # per-step data (full arrays, VMEM-resident)
    x_ref, ea_ref, ga_ref,
    recv_lane_ref, send_lane_ref, recv_sub_ref, send_sub_ref,
    # weights (repacked in wrapper for wide-K matmuls)
    w_ne, b_ne, w_ee, b_ee, w_ge, b_ge,
    w_eb_rs, w_eb_eg, b_eb,
    w_nb_rs, w_nb_xg, b_nb,
    w_gb, b_gb,
    w_d1, b_d1, w_d2, b_d2,
    # output
    out_ref,
):
    f32 = jnp.float32
    T, N, _ = x_ref.shape
    E = ea_ref.shape[1]
    nh = w_ne.shape[1]          # node hidden
    eh = w_ee.shape[1]          # edge hidden
    gh = w_ge.shape[1]          # global hidden (== edge hidden, see notes)

    def dot(a, b):
        return jnp.dot(a, b, preferred_element_type=f32)

    inv_E = 1.0 / E
    inv_N = 1.0 / N

    # initial latent global = encoded global of graph 0 (Linear(1, gh) is an
    # outer product -> broadcast multiply, no matmul).
    lat_g = jnp.maximum(ga_ref[...] * w_ge[...] + b_ge[...], 0.0)        # [1, gh]
    lat_x = None
    lat_e = None

    # T is small and static -> trace-time unrolled loop; latent state lives in
    # vregs across iterations (no VMEM scratch round trips).
    for t in range(T):
        # ---- per-step encoders (fused linear + ReLU) ----
        in_x = jnp.maximum(dot(x_ref[t], w_ne[...]) + b_ne[...], 0.0)    # [N, nh]
        in_e = jnp.maximum(ea_ref[t] * w_ee[...] + b_ee[...], 0.0)       # [E, eh]

        if t == 0:                       # h_init = first encoded graph
            lat_x = in_x
            lat_e = in_e

        # ---- incidence masks (VPU compares, no transposed-LHS matmuls) ----
        # gather orientation  [E, 2N]: cols 0..N-1 = one_hot(recv), N..2N-1 = one_hot(send)
        iota_e2n = jax.lax.broadcasted_iota(jnp.int32, (E, 2 * N), 1)
        RS = jnp.logical_or(iota_e2n == recv_sub_ref[t],
                            iota_e2n == send_sub_ref[t] + N).astype(f32)  # [E, 2N]
        # scatter orientation [N, 2E]: cols 0..E-1 = one_hot(recv).T, E..2E-1 = one_hot(send).T
        iota_ne = jax.lax.broadcasted_iota(jnp.int32, (N, E), 0)
        R_T = (iota_ne == recv_lane_ref[t]).astype(f32)                   # [N, E]
        S_T = (iota_ne == send_lane_ref[t]).astype(f32)                   # [N, E]
        RT_ST = jnp.concatenate([R_T, S_T], axis=1)                       # [N, 2E]

        g_E = jnp.broadcast_to(lat_g, (E, gh))
        g_N = jnp.broadcast_to(lat_g, (N, gh))

        cat_x = jnp.concatenate([in_x, lat_x], axis=1)                    # [N, 2nh]

        # ---- Edge block: relu(W_eb @ [cat_e, cat_x[recv], cat_x[send], g]) ----
        # project nodes first (one wide matmul), then gather with one matmul.
        y_both = dot(cat_x, w_eb_rs[...])                                 # [N, 2eh]
        Y = jnp.concatenate([y_both[:, :eh], y_both[:, eh:]], axis=0)     # [2N, eh]
        cat_e_g = jnp.concatenate([in_e, lat_e, g_E], axis=1)             # [E, 2eh+gh]
        acc_e = dot(cat_e_g, w_eb_eg[...]) + dot(RS, Y) + b_eb[...]
        new_e = jnp.maximum(acc_e, 0.0)                                   # [E, eh]

        # ---- Node block: scatter_add reducers as one incidence matmul ----
        z_both = dot(new_e, w_nb_rs[...])                                 # [E, 2nh]
        Z = jnp.concatenate([z_both[:, :nh], z_both[:, nh:]], axis=0)     # [2E, nh]
        cat_x_g = jnp.concatenate([cat_x, g_N], axis=1)                   # [N, 2nh+gh]
        acc_n = dot(RT_ST, Z) + dot(cat_x_g, w_nb_xg[...]) + b_nb[...]
        new_x = jnp.maximum(acc_n, 0.0)                                   # [N, nh]

        # ---- Global block: scatter_mean == sublane reduction (XLU) ----
        e_mean = jnp.sum(new_e, axis=0, keepdims=True) * inv_E            # [1, eh]
        n_mean = jnp.sum(new_x, axis=0, keepdims=True) * inv_N            # [1, nh]
        gb_in = jnp.concatenate([n_mean, e_mean, lat_g], axis=1)          # [1, nh+eh+gh]
        new_g = jnp.maximum(dot(gb_in, w_gb[...]) + b_gb[...], 0.0)       # [1, gh]

        lat_x, lat_e, lat_g = new_x, new_e, new_g

        # ---- node decoder (node_dec_for_input outputs are discarded -> DCE'd) ----
        h1 = jnp.maximum(dot(new_x, w_d1[...]) + b_d1[...], 0.0)
        out_ref[t] = (dot(h1, w_d2[...]) + b_d2[...]).astype(out_ref.dtype)


# ----------------------------- jitted wrapper --------------------------------

@jax.jit
def _ablation_1_core(params, x_all, ea_all, ga_all, ei_all):
    T, N, _ = x_all.shape
    E = ea_all.shape[1]

    w_ne, b_ne = params["node_enc"]
    w_ee, b_ee = params["edge_enc"]
    w_ge, b_ge = params["global_enc"]
    w_eb, b_eb = params["eb"]
    w_nb, b_nb = params["nb"]
    w_gb, b_gb = params["gb"]
    w_d1, b_d1 = params["node_dec1"]
    w_d2, b_d2 = params["node_dec2"]

    nh = w_ne.shape[1]
    eh = w_ee.shape[1]
    gh = w_ge.shape[1]
    out_size = w_d2.shape[1]

    # Wrapper-side weight repacking (one-time, tiny): lets the kernel issue a
    # few wide-K matmuls instead of many tiny per-segment ones.
    w_eb_rs = jnp.concatenate(                       # [2nh, 2eh]  (recv | send cols)
        [w_eb[2 * eh:2 * eh + 2 * nh], w_eb[2 * eh + 2 * nh:2 * eh + 4 * nh]], axis=1)
    w_eb_eg = jnp.concatenate(                       # [2eh+gh, eh] (cat_e rows + g rows)
        [w_eb[0:2 * eh], w_eb[2 * eh + 4 * nh:2 * eh + 4 * nh + gh]], axis=0)
    w_nb_rs = jnp.concatenate(                       # [eh, 2nh]   (recv_agg | sent_agg cols)
        [w_nb[0:eh], w_nb[eh:2 * eh]], axis=1)
    w_nb_xg = w_nb[2 * eh:2 * eh + 2 * nh + gh]      # [2nh+gh, nh] (cat_x rows + g rows)

    def b2(b):
        return b.reshape(1, -1)

    ga0 = ga_all[0].reshape(1, 1).astype(jnp.float32)   # only graph 0's global is used
    send_lane = ei_all[:, 0:1, :]                        # [T, 1, E]  lane layout
    recv_lane = ei_all[:, 1:2, :]
    send_sub = jnp.swapaxes(send_lane, 1, 2)             # [T, E, 1]  sublane layout
    recv_sub = jnp.swapaxes(recv_lane, 1, 2)

    inputs = [
        x_all.astype(jnp.float32), ea_all.astype(jnp.float32), ga0,
        recv_lane, send_lane, recv_sub, send_sub,
        w_ne, b2(b_ne), w_ee, b2(b_ee), w_ge, b2(b_ge),
        w_eb_rs, w_eb_eg, b2(b_eb),
        w_nb_rs, w_nb_xg, b2(b_nb),
        w_gb, b2(b_gb),
        w_d1, b2(b_d1), w_d2, b2(b_d2),
    ]

    # Single kernel invocation: full-array blocks (all block shapes == array
    # shapes, so no (8,128) divisibility issues); T iterated inside the kernel.
    in_specs = [pl.BlockSpec(a.shape, lambda i, _n=a.ndim: (0,) * _n) for a in inputs]

    return pl.pallas_call(
        _gn_fused_kernel,
        out_shape=jax.ShapeDtypeStruct((T, N, out_size), jnp.float32),
        grid=(1,),
        in_specs=in_specs,
        out_specs=pl.BlockSpec((T, N, out_size), lambda i: (0, 0, 0)),
        compiler_params=pltpu.CompilerParams(
            dimension_semantics=("arbitrary",),
        ),
    )(*inputs)


def ablation_1_forward(params, data, num_processing_steps):
    """data: list of graphs {'x':[N,in], 'edge_index':[2,E] int, 'edge_attr':[E,1],
       'global_attr':[1]}.  Returns (output_nodes_list, 0.0, 0.0, 0.0)."""
    graphs = data[:num_processing_steps]
    x_all = jnp.stack([g["x"] for g in graphs]).astype(jnp.float32)
    ea_all = jnp.stack([g["edge_attr"] for g in graphs]).astype(jnp.float32)
    ga_all = jnp.stack([g["global_attr"].reshape(1, 1) for g in graphs]).astype(jnp.float32)
    ei_all = jnp.stack([g["edge_index"] for g in graphs]).astype(jnp.int32)   # [T, 2, E]

    out = _ablation_1_core(params, x_all, ea_all, ga_all, ei_all)
    # PyTorch forward returns (output_nodes, 0.0, 0.0, 0.0); pred_inputs discarded.
    return [out[t] for t in range(num_processing_steps)], 0.0, 0.0, 0.0


# ----------------------------- parameters ------------------------------------

def _lin_init(key, din, dout, scale=0.1):
    kw, kb = jax.random.split(key)
    w = jax.random.normal(kw, (din, dout), jnp.float32) * scale
    b = jax.random.normal(kb, (dout,), jnp.float32) * scale
    return w, b


def init_params(key, input_size, node_h, edge_h, global_h, out_size):
    # global_enc outputs edge_h (mirrors the PyTorch code); the global path
    # only type-checks when global_h == edge_h.
    assert global_h == edge_h, "global_hidden_size must equal edge_hidden_size"
    # Keep hidden sizes multiples of 8 so wrapper-side weight row slices stay
    # sublane-aligned.
    ks = jax.random.split(key, 10)
    p = {}
    p["node_enc"] = _lin_init(ks[0], input_size, node_h)
    p["edge_enc"] = _lin_init(ks[1], 1, edge_h)
    p["global_enc"] = _lin_init(ks[2], 1, edge_h)
    p["eb"] = _lin_init(ks[3], (edge_h + node_h * 2) * 2 + global_h, edge_h)
    p["nb"] = _lin_init(ks[4], node_h * 2 + edge_h * 2 + global_h, node_h)
    p["gb"] = _lin_init(ks[5], node_h + edge_h + global_h, global_h)
    p["node_dec1"] = _lin_init(ks[6], node_h, node_h)
    p["node_dec2"] = _lin_init(ks[7], node_h, out_size)
    # node_dec_for_input exists in the module but its outputs are discarded by
    # forward(); kept for parameter parity, never evaluated (dead code).
    p["node_dec_in1"] = _lin_init(ks[8], node_h, node_h)
    p["node_dec_in2"] = _lin_init(ks[9], node_h, input_size)
    return p


# ----------------------------- pure-JAX reference ----------------------------

def _reference_forward(params, x_all, ea_all, ga_all, ei_all):
    HI = jax.lax.Precision.HIGHEST

    def mm(a, b):
        return jnp.dot(a, b, precision=HI)

    relu = jax.nn.relu
    T, N, _ = x_all.shape
    E = ea_all.shape[1]
    enc_x = [relu(mm(x_all[t], params["node_enc"][0]) + params["node_enc"][1]) for t in range(T)]
    enc_e = [relu(mm(ea_all[t], params["edge_enc"][0]) + params["edge_enc"][1]) for t in range(T)]
    lat_x, lat_e = enc_x[0], enc_e[0]
    lat_g = relu(mm(ga_all[0], params["global_enc"][0]) + params["global_enc"][1])
    outs = []
    for t in range(T):
        senders, receivers = ei_all[t, 0], ei_all[t, 1]
        S = jax.nn.one_hot(senders, N, dtype=jnp.float32)      # [E, N]
        R = jax.nn.one_hot(receivers, N, dtype=jnp.float32)
        cat_x = jnp.concatenate([enc_x[t], lat_x], axis=1)
        cat_e = jnp.concatenate([enc_e[t], lat_e], axis=1)
        g = lat_g
        eb_in = jnp.concatenate([cat_e, mm(R, cat_x), mm(S, cat_x),
                                 jnp.broadcast_to(g, (E, g.shape[1]))], axis=1)
        new_e = relu(mm(eb_in, params["eb"][0]) + params["eb"][1])
        nb_in = jnp.concatenate([mm(R.T, new_e), mm(S.T, new_e), cat_x,
                                 jnp.broadcast_to(g, (N, g.shape[1]))], axis=1)
        new_x = relu(mm(nb_in, params["nb"][0]) + params["nb"][1])
        gb_in = jnp.concatenate([jnp.mean(new_x, 0, keepdims=True),
                                 jnp.mean(new_e, 0, keepdims=True), g], axis=1)
        new_g = relu(mm(gb_in, params["gb"][0]) + params["gb"][1])
        lat_x, lat_e, lat_g = new_x, new_e, new_g
        h1 = relu(mm(new_x, params["node_dec1"][0]) + params["node_dec1"][1])
        outs.append(mm(h1, params["node_dec2"][0]) + params["node_dec2"][1])
    return jnp.stack(outs)


# ----------------------------- demo -------------------------------------------

if __name__ == "__main__":
    key = jax.random.PRNGKey(0)

    input_size = 8      # node_attr_size
    node_h = 16         # node_hidden_size
    edge_h = 16         # edge_hidden_size
    global_h = 16       # global_hidden_size (== edge_h, see note at top)
    out_size = 4
    N, E = 8, 16        # nodes / edges per graph
    T = 3               # num_processing_steps

    kp, kd = jax.random.split(key)
    params = init_params(kp, input_size, node_h, edge_h, global_h, out_size)

    data = []
    for t, dk in enumerate(jax.random.split(kd, T)):
        k1, k2, k3, k4 = jax.random.split(dk, 4)
        data.append({
            "x": jax.random.normal(k1, (N, input_size), jnp.float32),
            "edge_attr": jax.random.normal(k2, (E, 1), jnp.float32),
            "edge_index": jnp.stack([
                jax.random.randint(k3, (E,), 0, N, jnp.int32),
                jax.random.randint(k4, (E,), 0, N, jnp.int32),
            ], axis=0),
            "global_attr": jnp.ones((1,), jnp.float32) * float(t + 1),
        })

    # TODO(synk): SAITS sub-module is instantiated in __init__ but never used in
    # forward(); x_masks / x_holdouts / indicates / stage are likewise unused.
    outs, r0, r1, r2 = ablation_1_forward(params, data, T)
    jax.block_until_ready(outs)

    assert len(outs) == T
    assert all(o.shape == (N, out_size) for o in outs)
    assert all(bool(jnp.all(jnp.isfinite(o))) for o in outs)

    # numerical check against a pure-JAX reference of the same forward
    x_all = jnp.stack([g["x"] for g in data])
    ea_all = jnp.stack([g["edge_attr"] for g in data])
    ga_all = jnp.stack([g["global_attr"].reshape(1, 1) for g in data])
    ei_all = jnp.stack([g["edge_index"] for g in data]).astype(jnp.int32)
    ref = _reference_forward(params, x_all, ea_all, ga_all, ei_all)
    got = jnp.stack(outs)
    assert bool(jnp.allclose(got, ref, rtol=1e-3, atol=1e-3)), \
        f"max abs diff {float(jnp.max(jnp.abs(got - ref)))}"

    print("KERNEL_OK")
</pallas_src>

<mosaic_0001>
module attributes {stable_mosaic.version = 11 : i64} {
  func.func @_gn_fused_kernel(%arg0: i32, %arg1: memref<3x8x8xf32, #tpu.memory_space<vmem>>, %arg2: memref<3x16x1xf32, #tpu.memory_space<vmem>>, %arg3: memref<1x1xf32, #tpu.memory_space<vmem>>, %arg4: memref<3x1x16xi32, #tpu.memory_space<vmem>>, %arg5: memref<3x1x16xi32, #tpu.memory_space<vmem>>, %arg6: memref<3x16x1xi32, #tpu.memory_space<vmem>>, %arg7: memref<3x16x1xi32, #tpu.memory_space<vmem>>, %arg8: memref<8x16xf32, #tpu.memory_space<vmem>>, %arg9: memref<1x16xf32, #tpu.memory_space<vmem>>, %arg10: memref<1x16xf32, #tpu.memory_space<vmem>>, %arg11: memref<1x16xf32, #tpu.memory_space<vmem>>, %arg12: memref<1x16xf32, #tpu.memory_space<vmem>>, %arg13: memref<1x16xf32, #tpu.memory_space<vmem>>, %arg14: memref<32x32xf32, #tpu.memory_space<vmem>>, %arg15: memref<48x16xf32, #tpu.memory_space<vmem>>, %arg16: memref<1x16xf32, #tpu.memory_space<vmem>>, %arg17: memref<16x32xf32, #tpu.memory_space<vmem>>, %arg18: memref<48x16xf32, #tpu.memory_space<vmem>>, %arg19: memref<1x16xf32, #tpu.memory_space<vmem>>, %arg20: memref<48x16xf32, #tpu.memory_space<vmem>>, %arg21: memref<1x16xf32, #tpu.memory_space<vmem>>, %arg22: memref<16x16xf32, #tpu.memory_space<vmem>>, %arg23: memref<1x16xf32, #tpu.memory_space<vmem>>, %arg24: memref<16x4xf32, #tpu.memory_space<vmem>>, %arg25: memref<1x4xf32, #tpu.memory_space<vmem>>, %arg26: memref<3x8x4xf32, #tpu.memory_space<vmem>>) attributes {dimension_semantics = [#tpu.dimension_semantics<arbitrary>], iteration_bounds = array<i64: 1>, scalar_prefetch = 0 : i64, scratch_operands = 0 : i64, tpu.core_type = #tpu.core_type<tc>, window_params = [{pipeline_mode = #tpu.pipeline_mode<synchronous>, transform_indices = @transform_0, window_bounds = array<i64: 3, 8, 8>}, {pipeline_mode = #tpu.pipeline_mode<synchronous>, transform_indices = @transform_1, window_bounds = array<i64: 3, 16, 1>}, {pipeline_mode = #tpu.pipeline_mode<synchronous>, transform_indices = @transform_2, window_bounds = array<i64: 1, 1>}, {pipeline_mode = #tpu.pipeline_mode<synchronous>, transform_indices = @transform_3, window_bounds = array<i64: 3, 1, 16>}, {pipeline_mode = #tpu.pipeline_mode<synchronous>, transform_indices = @transform_4, window_bounds = array<i64: 3, 1, 16>}, {pipeline_mode = #tpu.pipeline_mode<synchronous>, transform_indices = @transform_5, window_bounds = array<i64: 3, 16, 1>}, {pipeline_mode = #tpu.pipeline_mode<synchronous>, transform_indices = @transform_6, window_bounds = array<i64: 3, 16, 1>}, {pipeline_mode = #tpu.pipeline_mode<synchronous>, transform_indices = @transform_7, window_bounds = array<i64: 8, 16>}, {pipeline_mode = #tpu.pipeline_mode<synchronous>, transform_indices = @transform_8, window_bounds = array<i64: 1, 16>}, {pipeline_mode = #tpu.pipeline_mode<synchronous>, transform_indices = @transform_9, window_bounds = array<i64: 1, 16>}, {pipeline_mode = #tpu.pipeline_mode<synchronous>, transform_indices = @transform_10, window_bounds = array<i64: 1, 16>}, {pipeline_mode = #tpu.pipeline_mode<synchronous>, transform_indices = @transform_11, window_bounds = array<i64: 1, 16>}, {pipeline_mode = #tpu.pipeline_mode<synchronous>, transform_indices = @transform_12, window_bounds = array<i64: 1, 16>}, {pipeline_mode = #tpu.pipeline_mode<synchronous>, transform_indices = @transform_13, window_bounds = array<i64: 32, 32>}, {pipeline_mode = #tpu.pipeline_mode<synchronous>, transform_indices = @transform_14, window_bounds = array<i64: 48, 16>}, {pipeline_mode = #tpu.pipeline_mode<synchronous>, transform_indices = @transform_15, window_bounds = array<i64: 1, 16>}, {pipeline_mode = #tpu.pipeline_mode<synchronous>, transform_indices = @transform_16, window_bounds = array<i64: 16, 32>}, {pipeline_mode = #tpu.pipeline_mode<synchronous>, transform_indices = @transform_17, window_bounds = array<i64: 48, 16>}, {pipeline_mode = #tpu.pipeline_mode<synchronous>, transform_indices = @transform_18, window_bounds = array<i64: 1, 16>}, {pipeline_mode = #tpu.pipeline_mode<synchronous>, transform_indices = @transform_19, window_bounds = array<i64: 48, 16>}, {pipeline_mode = #tpu.pipeline_mode<synchronous>, transform_indices = @transform_20, window_bounds = array<i64: 1, 16>}, {pipeline_mode = #tpu.pipeline_mode<synchronous>, transform_indices = @transform_21, window_bounds = array<i64: 16, 16>}, {pipeline_mode = #tpu.pipeline_mode<synchronous>, transform_indices = @transform_22, window_bounds = array<i64: 1, 16>}, {pipeline_mode = #tpu.pipeline_mode<synchronous>, transform_indices = @transform_23, window_bounds = array<i64: 16, 4>}, {pipeline_mode = #tpu.pipeline_mode<synchronous>, transform_indices = @transform_24, window_bounds = array<i64: 1, 4>}, {pipeline_mode = #tpu.pipeline_mode<synchronous>, transform_indices = @transform_25, window_bounds = array<i64: 3, 8, 4>}]} {
    %c0 = arith.constant 0 : index
    %c0_0 = arith.constant 0 : index
    %0 = vector.load %arg3[%c0, %c0_0] : memref<1x1xf32, #tpu.memory_space<vmem>>, vector<1x1xf32>
    %c0_1 = arith.constant 0 : index
    %c0_2 = arith.constant 0 : index
    %1 = vector.load %arg12[%c0_1, %c0_2] : memref<1x16xf32, #tpu.memory_space<vmem>>, vector<1x16xf32>
    %2 = vector.broadcast %0 : vector<1x1xf32> to vector<1x16xf32>
    %3 = arith.mulf %2, %1 : vector<1x16xf32>
    %c0_3 = arith.constant 0 : index
    %c0_4 = arith.constant 0 : index
    %4 = vector.load %arg13[%c0_3, %c0_4] : memref<1x16xf32, #tpu.memory_space<vmem>>, vector<1x16xf32>
    %5 = arith.addf %3, %4 : vector<1x16xf32>
    %cst = arith.constant 0.000000e+00 : f32
    %6 = vector.broadcast %cst : f32 to vector<1x16xf32>
    %7 = arith.maximumf %5, %6 : vector<1x16xf32>
    %c0_5 = arith.constant 0 : index
    %c0_6 = arith.constant 0 : index
    %c0_7 = arith.constant 0 : index
    %8 = vector.load %arg1[%c0_5, %c0_6, %c0_7] : memref<3x8x8xf32, #tpu.memory_space<vmem>>, vector<1x8x8xf32>
    %9 = vector.shape_cast %8 : vector<1x8x8xf32> to vector<8x8xf32>
    %c0_8 = arith.constant 0 : index
    %c0_9 = arith.constant 0 : index
    %10 = vector.load %arg8[%c0_8, %c0_9] : memref<8x16xf32, #tpu.memory_space<vmem>>, vector<8x16xf32>
    %cst_10 = arith.constant dense<0.000000e+00> : vector<8x16xf32>
    %11 = tpu.matmul %9, %10, %cst_10 {dimension_numbers = #tpu.dot_dimension_numbers<[1], [0], [0], [1], [0, 0, 1, 1], [], []>} : vector<8x8xf32>, vector<8x16xf32>, vector<8x16xf32> -> vector<8x16xf32>
    %c0_11 = arith.constant 0 : index
    %c0_12 = arith.constant 0 : index
    %12 = vector.load %arg9[%c0_11, %c0_12] : memref<1x16xf32, #tpu.memory_space<vmem>>, vector<1x16xf32>
    %13 = vector.broadcast %12 : vector<1x16xf32> to vector<8x16xf32>
    %14 = arith.addf %11, %13 : vector<8x16xf32>
    %cst_13 = arith.constant 0.000000e+00 : f32
    %15 = vector.broadcast %cst_13 : f32 to vector<8x16xf32>
    %16 = arith.maximumf %14, %15 : vector<8x16xf32>
    %c0_14 = arith.constant 0 : index
    %c0_15 = arith.constant 0 : index
    %c0_16 = arith.constant 0 : index
    %17 = vector.load %arg2[%c0_14, %c0_15, %c0_16] : memref<3x16x1xf32, #tpu.memory_space<vmem>>, vector<1x16x1xf32>
    %18 = vector.shape_cast %17 : vector<1x16x1xf32> to vector<16x1xf32>
    %c0_17 = arith.constant 0 : index
    %c0_18 = arith.constant 0 : index
    %19 = vector.load %arg10[%c0_17, %c0_18] : memref<1x16xf32, #tpu.memory_space<vmem>>, vector<1x16xf32>
    %20 = vector.broadcast %18 : vector<16x1xf32> to vector<16x16xf32>
    %21 = vector.broadcast %19 : vector<1x16xf32> to vector<16x16xf32>
    %22 = arith.mulf %20, %21 : vector<16x16xf32>
    %c0_19 = arith.constant 0 : index
    %c0_20 = arith.constant 0 : index
    %23 = vector.load %arg11[%c0_19, %c0_20] : memref<1x16xf32, #tpu.memory_space<vmem>>, vector<1x16xf32>
    %24 = vector.broadcast %23 : vector<1x16xf32> to vector<16x16xf32>
    %25 = arith.addf %22, %24 : vector<16x16xf32>
    %cst_21 = arith.constant 0.000000e+00 : f32
    %26 = vector.broadcast %cst_21 : f32 to vector<16x16xf32>
    %27 = arith.maximumf %25, %26 : vector<16x16xf32>
    %28 = tpu.iota {dimensions = array<i32: 1>} : vector<16x16xi32>
    %c0_22 = arith.constant 0 : index
    %c0_23 = arith.constant 0 : index
    %c0_24 = arith.constant 0 : index
    %29 = vector.load %arg6[%c0_22, %c0_23, %c0_24] : memref<3x16x1xi32, #tpu.memory_space<vmem>>, vector<1x16x1xi32>
    %30 = vector.shape_cast %29 : vector<1x16x1xi32> to vector<16x1xi32>
    %31 = vector.broadcast %30 : vector<16x1xi32> to vector<16x16xi32>
    %32 = arith.cmpi eq, %28, %31 : vector<16x16xi32>
    %c0_25 = arith.constant 0 : index
    %c0_26 = arith.constant 0 : index
    %c0_27 = arith.constant 0 : index
    %33 = vector.load %arg7[%c0_25, %c0_26, %c0_27] : memref<3x16x1xi32, #tpu.memory_space<vmem>>, vector<1x16x1xi32>
    %34 = vector.shape_cast %33 : vector<1x16x1xi32> to vector<16x1xi32>
    %c8_i32 = arith.constant 8 : i32
    %35 = vector.broadcast %c8_i32 : i32 to vector<16x1xi32>
    %36 = arith.addi %34, %35 : vector<16x1xi32>
    %37 = vector.broadcast %36 : vector<16x1xi32> to vector<16x16xi32>
    %38 = arith.cmpi eq, %28, %37 : vector<16x16xi32>
    %39 = arith.ori %32, %38 : vector<16x16xi1>
    %40 = arith.extui %39 : vector<16x16xi1> to vector<16x16xi32>
    %41 = arith.sitofp %40 : vector<16x16xi32> to vector<16x16xf32>
    %42 = tpu.iota {dimensions = array<i32: 0>} : vector<8x16xi32>
    %c0_28 = arith.constant 0 : index
    %c0_29 = arith.constant 0 : index
    %c0_30 = arith.constant 0 : index
    %43 = vector.load %arg4[%c0_28, %c0_29, %c0_30] : memref<3x1x16xi32, #tpu.memory_space<vmem>>, vector<1x1x16xi32>
    %44 = vector.shape_cast %43 : vector<1x1x16xi32> to vector<1x16xi32>
    %45 = vector.broadcast %44 : vector<1x16xi32> to vector<8x16xi32>
    %46 = arith.cmpi eq, %42, %45 : vector<8x16xi32>
    %47 = arith.extui %46 : vector<8x16xi1> to vector<8x16xi32>
    %48 = arith.sitofp %47 : vector<8x16xi32> to vector<8x16xf32>
    %c0_31 = arith.constant 0 : index
    %c0_32 = arith.constant 0 : index
    %c0_33 = arith.constant 0 : index
    %49 = vector.load %arg5[%c0_31, %c0_32, %c0_33] : memref<3x1x16xi32, #tpu.memory_space<vmem>>, vector<1x1x16xi32>
    %50 = vector.shape_cast %49 : vector<1x1x16xi32> to vector<1x16xi32>
    %51 = vector.broadcast %50 : vector<1x16xi32> to vector<8x16xi32>
    %52 = arith.cmpi eq, %42, %51 : vector<8x16xi32>
    %53 = arith.extui %52 : vector<8x16xi1> to vector<8x16xi32>
    %54 = arith.sitofp %53 : vector<8x16xi32> to vector<8x16xf32>
    %55 = tpu.concatenate %48, %54 in 1 : vector<8x16xf32>, vector<8x16xf32> -> vector<8x32xf32>
    %56 = vector.shape_cast %7 : vector<1x16xf32> to vector<1x16xf32>
    %57 = vector.broadcast %56 : vector<1x16xf32> to vector<16x16xf32>
    %58 = vector.shape_cast %7 : vector<1x16xf32> to vector<1x16xf32>
    %59 = vector.broadcast %58 : vector<1x16xf32> to vector<8x16xf32>
    %60 = tpu.concatenate %16, %16 in 1 : vector<8x16xf32>, vector<8x16xf32> -> vector<8x32xf32>
    %c0_34 = arith.constant 0 : index
    %c0_35 = arith.constant 0 : index
    %61 = vector.load %arg14[%c0_34, %c0_35] : memref<32x32xf32, #tpu.memory_space<vmem>>, vector<32x32xf32>
    %cst_36 = arith.constant dense<0.000000e+00> : vector<8x32xf32>
    %62 = tpu.matmul %60, %61, %cst_36 {dimension_numbers = #tpu.dot_dimension_numbers<[1], [0], [0], [1], [0, 0, 1, 1], [], []>} : vector<8x32xf32>, vector<32x32xf32>, vector<8x32xf32> -> vector<8x32xf32>
    %63 = vector.extract_strided_slice %62 {offsets = [0, 0], sizes = [8, 16], strides = [1, 1]} : vector<8x32xf32> to vector<8x16xf32>
    %64 = vector.extract_strided_slice %62 {offsets = [0, 16], sizes = [8, 16], strides = [1, 1]} : vector<8x32xf32> to vector<8x16xf32>
    %65 = tpu.concatenate %63, %64 in 0 : vector<8x16xf32>, vector<8x16xf32> -> vector<16x16xf32>
    %66 = tpu.concatenate %27, %27, %57 in 1 : vector<16x16xf32>, vector<16x16xf32>, vector<16x16xf32> -> vector<16x48xf32>
    %c0_37 = arith.constant 0 : index
    %c0_38 = arith.constant 0 : index
    %67 = vector.load %arg15[%c0_37, %c0_38] : memref<48x16xf32, #tpu.memory_space<vmem>>, vector<48x16xf32>
    %cst_39 = arith.constant dense<0.000000e+00> : vector<16x16xf32>
    %68 = tpu.matmul %66, %67, %cst_39 {dimension_numbers = #tpu.dot_dimension_numbers<[1], [0], [0], [1], [0, 0, 1, 1], [], []>} : vector<16x48xf32>, vector<48x16xf32>, vector<16x16xf32> -> vector<16x16xf32>
    %cst_40 = arith.constant dense<0.000000e+00> : vector<16x16xf32>
    %69 = tpu.matmul %41, %65, %cst_40 {dimension_numbers = #tpu.dot_dimension_numbers<[1], [0], [0], [1], [0, 0, 1, 1], [], []>} : vector<16x16xf32>, vector<16x16xf32>, vector<16x16xf32> -> vector<16x16xf32>
    %70 = arith.addf %68, %69 : vector<16x16xf32>
    %c0_41 = arith.constant 0 : index
    %c0_42 = arith.constant 0 : index
    %71 = vector.load %arg16[%c0_41, %c0_42] : memref<1x16xf32, #tpu.memory_space<vmem>>, vector<1x16xf32>
    %72 = vector.broadcast %71 : vector<1x16xf32> to vector<16x16xf32>
    %73 = arith.addf %70, %72 : vector<16x16xf32>
    %cst_43 = arith.constant 0.000000e+00 : f32
    %74 = vector.broadcast %cst_43 : f32 to vector<16x16xf32>
    %75 = arith.maximumf %73, %74 : vector<16x16xf32>
    %c0_44 = arith.constant 0 : index
    %c0_45 = arith.constant 0 : index
    %76 = vector.load %arg17[%c0_44, %c0_45] : memref<16x32xf32, #tpu.memory_space<vmem>>, vector<16x32xf32>
    %cst_46 = arith.constant dense<0.000000e+00> : vector<16x32xf32>
    %77 = tpu.matmul %75, %76, %cst_46 {dimension_numbers = #tpu.dot_dimension_numbers<[1], [0], [0], [1], [0, 0, 1, 1], [], []>} : vector<16x16xf32>, vector<16x32xf32>, vector<16x32xf32> -> vector<16x32xf32>
    %78 = vector.extract_strided_slice %77 {offsets = [0, 0], sizes = [16, 16], strides = [1, 1]} : vector<16x32xf32> to vector<16x16xf32>
    %79 = vector.extract_strided_slice %77 {offsets = [0, 16], sizes = [16, 16], strides = [1, 1]} : vector<16x32xf32> to vector<16x16xf32>
    %80 = tpu.concatenate %78, %79 in 0 : vector<16x16xf32>, vector<16x16xf32> -> vector<32x16xf32>
    %81 = tpu.concatenate %60, %59 in 1 : vector<8x32xf32>, vector<8x16xf32> -> vector<8x48xf32>
    %cst_47 = arith.constant dense<0.000000e+00> : vector<8x16xf32>
    %82 = tpu.matmul %55, %80, %cst_47 {dimension_numbers = #tpu.dot_dimension_numbers<[1], [0], [0], [1], [0, 0, 1, 1], [], []>} : vector<8x32xf32>, vector<32x16xf32>, vector<8x16xf32> -> vector<8x16xf32>
    %c0_48 = arith.constant 0 : index
    %c0_49 = arith.constant 0 : index
    %83 = vector.load %arg18[%c0_48, %c0_49] : memref<48x16xf32, #tpu.memory_space<vmem>>, vector<48x16xf32>
    %cst_50 = arith.constant dense<0.000000e+00> : vector<8x16xf32>
    %84 = tpu.matmul %81, %83, %cst_50 {dimension_numbers = #tpu.dot_dimension_numbers<[1], [0], [0], [1], [0, 0, 1, 1], [], []>} : vector<8x48xf32>, vector<48x16xf32>, vector<8x16xf32> -> vector<8x16xf32>
    %85 = arith.addf %82, %84 : vector<8x16xf32>
    %c0_51 = arith.constant 0 : index
    %c0_52 = arith.constant 0 : index
    %86 = vector.load %arg19[%c0_51, %c0_52] : memref<1x16xf32, #tpu.memory_space<vmem>>, vector<1x16xf32>
    %87 = vector.broadcast %86 : vector<1x16xf32> to vector<8x16xf32>
    %88 = arith.addf %85, %87 : vector<8x16xf32>
    %cst_53 = arith.constant 0.000000e+00 : f32
    %89 = vector.broadcast %cst_53 : f32 to vector<8x16xf32>
    %90 = arith.maximumf %88, %89 : vector<8x16xf32>
    %cst_54 = arith.constant dense<0.000000e+00> : vector<16xf32>
    %91 = vector.multi_reduction <add>, %75, %cst_54 [0] : vector<16x16xf32> to vector<16xf32>
    %92 = vector.shape_cast %91 : vector<16xf32> to vector<1x16xf32>
    %cst_55 = arith.constant 6.250000e-02 : f32
    %93 = vector.broadcast %cst_55 : f32 to vector<1x16xf32>
    %94 = arith.mulf %92, %93 : vector<1x16xf32>
    %cst_56 = arith.constant dense<0.000000e+00> : vector<16xf32>
    %95 = vector.multi_reduction <add>, %90, %cst_56 [0] : vector<8x16xf32> to vector<16xf32>
    %96 = vector.shape_cast %95 : vector<16xf32> to vector<1x16xf32>
    %cst_57 = arith.constant 1.250000e-01 : f32
    %97 = vector.broadcast %cst_57 : f32 to vector<1x16xf32>
    %98 = arith.mulf %96, %97 : vector<1x16xf32>
    %99 = tpu.concatenate %98, %94, %7 in 1 : vector<1x16xf32>, vector<1x16xf32>, vector<1x16xf32> -> vector<1x48xf32>
    %c0_58 = arith.constant 0 : index
    %c0_59 = arith.constant 0 : index
    %100 = vector.load %arg20[%c0_58, %c0_59] : memref<48x16xf32, #tpu.memory_space<vmem>>, vector<48x16xf32>
    %cst_60 = arith.constant dense<0.000000e+00> : vector<1x16xf32>
    %101 = tpu.matmul %99, %100, %cst_60 {dimension_numbers = #tpu.dot_dimension_numbers<[1], [0], [0], [1], [0, 0, 1, 1], [], []>} : vector<1x48xf32>, vector<48x16xf32>, vector<1x16xf32> -> vector<1x16xf32>
    %c0_61 = arith.constant 0 : index
    %c0_62 = arith.constant 0 : index
    %102 = vector.load %arg21[%c0_61, %c0_62] : memref<1x16xf32, #tpu.memory_space<vmem>>, vector<1x16xf32>
    %103 = arith.addf %101, %102 : vector<1x16xf32>
    %cst_63 = arith.constant 0.000000e+00 : f32
    %104 = vector.broadcast %cst_63 : f32 to vector<1x16xf32>
    %105 = arith.maximumf %103, %104 : vector<1x16xf32>
    %c0_64 = arith.constant 0 : index
    %c0_65 = arith.constant 0 : index
    %106 = vector.load %arg22[%c0_64, %c0_65] : memref<16x16xf32, #tpu.memory_space<vmem>>, vector<16x16xf32>
    %cst_66 = arith.constant dense<0.000000e+00> : vector<8x16xf32>
    %107 = tpu.matmul %90, %106, %cst_66 {dimension_numbers = #tpu.dot_dimension_numbers<[1], [0], [0], [1], [0, 0, 1, 1], [], []>} : vector<8x16xf32>, vector<16x16xf32>, vector<8x16xf32> -> vector<8x16xf32>
    %c0_67 = arith.constant 0 : index
    %c0_68 = arith.constant 0 : index
    %108 = vector.load %arg23[%c0_67, %c0_68] : memref<1x16xf32, #tpu.memory_space<vmem>>, vector<1x16xf32>
    %109 = vector.broadcast %108 : vector<1x16xf32> to vector<8x16xf32>
    %110 = arith.addf %107, %109 : vector<8x16xf32>
    %cst_69 = arith.constant 0.000000e+00 : f32
    %111 = vector.broadcast %cst_69 : f32 to vector<8x16xf32>
    %112 = arith.maximumf %110, %111 : vector<8x16xf32>
    %c0_70 = arith.constant 0 : index
    %c0_71 = arith.constant 0 : index
    %113 = vector.load %arg24[%c0_70, %c0_71] : memref<16x4xf32, #tpu.memory_space<vmem>>, vector<16x4xf32>
    %cst_72 = arith.constant dense<0.000000e+00> : vector<8x4xf32>
    %114 = tpu.matmul %112, %113, %cst_72 {dimension_numbers = #tpu.dot_dimension_numbers<[1], [0], [0], [1], [0, 0, 1, 1], [], []>} : vector<8x16xf32>, vector<16x4xf32>, vector<8x4xf32> -> vector<8x4xf32>
    %c0_73 = arith.constant 0 : index
    %c0_74 = arith.constant 0 : index
    %115 = vector.load %arg25[%c0_73, %c0_74] : memref<1x4xf32, #tpu.memory_space<vmem>>, vector<1x4xf32>
    %116 = vector.broadcast %115 : vector<1x4xf32> to vector<8x4xf32>
    %117 = arith.addf %114, %116 : vector<8x4xf32>
    %c0_75 = arith.constant 0 : index
    %c0_76 = arith.constant 0 : index
    %c0_77 = arith.constant 0 : index
    %118 = vector.load %arg26[%c0_75, %c0_76, %c0_77] : memref<3x8x4xf32, #tpu.memory_space<vmem>>, vector<1x8x4xf32>
    %119 = vector.shape_cast %118 : vector<1x8x4xf32> to vector<8x4xf32>
    %120 = vector.shape_cast %117 : vector<8x4xf32> to vector<1x8x4xf32>
    tpu.vector_store %arg26[%c0_75, %c0_76, %c0_77], %120 {strides = array<i32>} : memref<3x8x4xf32, #tpu.memory_space<vmem>>, vector<1x8x4xf32>,
    %c1 = arith.constant 1 : index
    %c0_78 = arith.constant 0 : index
    %c0_79 = arith.constant 0 : index
    %121 = vector.load %arg1[%c1, %c0_78, %c0_79] : memref<3x8x8xf32, #tpu.memory_space<vmem>>, vector<1x8x8xf32>
    %122 = vector.shape_cast %121 : vector<1x8x8xf32> to vector<8x8xf32>
    %c0_80 = arith.constant 0 : index
    %c0_81 = arith.constant 0 : index
    %123 = vector.load %arg8[%c0_80, %c0_81] : memref<8x16xf32, #tpu.memory_space<vmem>>, vector<8x16xf32>
    %cst_82 = arith.constant dense<0.000000e+00> : vector<8x16xf32>
    %124 = tpu.matmul %122, %123, %cst_82 {dimension_numbers = #tpu.dot_dimension_numbers<[1], [0], [0], [1], [0, 0, 1, 1], [], []>} : vector<8x8xf32>, vector<8x16xf32>, vector<8x16xf32> -> vector<8x16xf32>
    %c0_83 = arith.constant 0 : index
    %c0_84 = arith.constant 0 : index
    %125 = vector.load %arg9[%c0_83, %c0_84] : memref<1x16xf32, #tpu.memory_space<vmem>>, vector<1x16xf32>
    %126 = vector.broadcast %125 : vector<1x16xf32> to vector<8x16xf32>
    %127 = arith.addf %124, %126 : vector<8x16xf32>
    %cst_85 = arith.constant 0.000000e+00 : f32
    %128 = vector.broadcast %cst_85 : f32 to vector<8x16xf32>
    %129 = arith.maximumf %127, %128 : vector<8x16xf32>
    %c1_86 = arith.constant 1 : index
    %c0_87 = arith.constant 0 : index
    %c0_88 = arith.constant 0 : index
    %130 = vector.load %arg2[%c1_86, %c0_87, %c0_88] : memref<3x16x1xf32, #tpu.memory_space<vmem>>, vector<1x16x1xf32>
    %131 = vector.shape_cast %130 : vector<1x16x1xf32> to vector<16x1xf32>
    %c0_89 = arith.constant 0 : index
    %c0_90 = arith.constant 0 : index
    %132 = vector.load %arg10[%c0_89, %c0_90] : memref<1x16xf32, #tpu.memory_space<vmem>>, vector<1x16xf32>
    %133 = vector.broadcast %131 : vector<16x1xf32> to vector<16x16xf32>
    %134 = vector.broadcast %132 : vector<1x16xf32> to vector<16x16xf32>
    %135 = arith.mulf %133, %134 : vector<16x16xf32>
    %c0_91 = arith.constant 0 : index
    %c0_92 = arith.constant 0 : index
    %136 = vector.load %arg11[%c0_91, %c0_92] : memref<1x16xf32, #tpu.memory_space<vmem>>, vector<1x16xf32>
    %137 = vector.broadcast %136 : vector<1x16xf32> to vector<16x16xf32>
    %138 = arith.addf %135, %137 : vector<16x16xf32>
    %cst_93 = arith.constant 0.000000e+00 : f32
    %139 = vector.broadcast %cst_93 : f32 to vector<16x16xf32>
    %140 = arith.maximumf %138, %139 : vector<16x16xf32>
    %141 = tpu.iota {dimensions = array<i32: 1>} : vector<16x16xi32>
    %c1_94 = arith.constant 1 : index
    %c0_95 = arith.constant 0 : index
    %c0_96 = arith.constant 0 : index
    %142 = vector.load %arg6[%c1_94, %c0_95, %c0_96] : memref<3x16x1xi32, #tpu.memory_space<vmem>>, vector<1x16x1xi32>
    %143 = vector.shape_cast %142 : vector<1x16x1xi32> to vector<16x1xi32>
    %144 = vector.broadcast %143 : vector<16x1xi32> to vector<16x16xi32>
    %145 = arith.cmpi eq, %141, %144 : vector<16x16xi32>
    %c1_97 = arith.constant 1 : index
    %c0_98 = arith.constant 0 : index
    %c0_99 = arith.constant 0 : index
    %146 = vector.load %arg7[%c1_97, %c0_98, %c0_99] : memref<3x16x1xi32, #tpu.memory_space<vmem>>, vector<1x16x1xi32>
    %147 = vector.shape_cast %146 : vector<1x16x1xi32> to vector<16x1xi32>
    %c8_i32_100 = arith.constant 8 : i32
    %148 = vector.broadcast %c8_i32_100 : i32 to vector<16x1xi32>
    %149 = arith.addi %147, %148 : vector<16x1xi32>
    %150 = vector.broadcast %149 : vector<16x1xi32> to vector<16x16xi32>
    %151 = arith.cmpi eq, %141, %150 : vector<16x16xi32>
    %152 = arith.ori %145, %151 : vector<16x16xi1>
    %153 = arith.extui %152 : vector<16x16xi1> to vector<16x16xi32>
    %154 = arith.sitofp %153 : vector<16x16xi32> to vector<16x16xf32>
    %155 = tpu.iota {dimensions = array<i32: 0>} : vector<8x16xi32>
    %c1_101 = arith.constant 1 : index
    %c0_102 = arith.constant 0 : index
    %c0_103 = arith.constant 0 : index
    %156 = vector.load %arg4[%c1_101, %c0_102, %c0_103] : memref<3x1x16xi32, #tpu.memory_space<vmem>>, vector<1x1x16xi32>
    %157 = vector.shape_cast %156 : vector<1x1x16xi32> to vector<1x16xi32>
    %158 = vector.broadcast %157 : vector<1x16xi32> to vector<8x16xi32>
    %159 = arith.cmpi eq, %155, %158 : vector<8x16xi32>
    %160 = arith.extui %159 : vector<8x16xi1> to vector<8x16xi32>
    %161 = arith.sitofp %160 : vector<8x16xi32> to vector<8x16xf32>
    %c1_104 = arith.constant 1 : index
    %c0_105 = arith.constant 0 : index
    %c0_106 = arith.constant 0 : index
    %162 = vector.load %arg5[%c1_104, %c0_105, %c0_106] : memref<3x1x16xi32, #tpu.memory_space<vmem>>, vector<1x1x16xi32>
    %163 = vector.shape_cast %162 : vector<1x1x16xi32> to vector<1x16xi32>
    %164 = vector.broadcast %163 : vector<1x16xi32> to vector<8x16xi32>
    %165 = arith.cmpi eq, %155, %164 : vector<8x16xi32>
    %166 = arith.extui %165 : vector<8x16xi1> to vector<8x16xi32>
    %167 = arith.sitofp %166 : vector<8x16xi32> to vector<8x16xf32>
    %168 = tpu.concatenate %161, %167 in 1 : vector<8x16xf32>, vector<8x16xf32> -> vector<8x32xf32>
    %169 = vector.shape_cast %105 : vector<1x16xf32> to vector<1x16xf32>
    %170 = vector.broadcast %169 : vector<1x16xf32> to vector<16x16xf32>
    %171 = vector.shape_cast %105 : vector<1x16xf32> to vector<1x16xf32>
    %172 = vector.broadcast %171 : vector<1x16xf32> to vector<8x16xf32>
    %173 = tpu.concatenate %129, %90 in 1 : vector<8x16xf32>, vector<8x16xf32> -> vector<8x32xf32>
    %c0_107 = arith.constant 0 : index
    %c0_108 = arith.constant 0 : index
    %174 = vector.load %arg14[%c0_107, %c0_108] : memref<32x32xf32, #tpu.memory_space<vmem>>, vector<32x32xf32>
    %cst_109 = arith.constant dense<0.000000e+00> : vector<8x32xf32>
    %175 = tpu.matmul %173, %174, %cst_109 {dimension_numbers = #tpu.dot_dimension_numbers<[1], [0], [0], [1], [0, 0, 1, 1], [], []>} : vector<8x32xf32>, vector<32x32xf32>, vector<8x32xf32> -> vector<8x32xf32>
    %176 = vector.extract_strided_slice %175 {offsets = [0, 0], sizes = [8, 16], strides = [1, 1]} : vector<8x32xf32> to vector<8x16xf32>
    %177 = vector.extract_strided_slice %175 {offsets = [0, 16], sizes = [8, 16], strides = [1, 1]} : vector<8x32xf32> to vector<8x16xf32>
    %178 = tpu.concatenate %176, %177 in 0 : vector<8x16xf32>, vector<8x16xf32> -> vector<16x16xf32>
    %179 = tpu.concatenate %140, %75, %170 in 1 : vector<16x16xf32>, vector<16x16xf32>, vector<16x16xf32> -> vector<16x48xf32>
    %c0_110 = arith.constant 0 : index
    %c0_111 = arith.constant 0 : index
    %180 = vector.load %arg15[%c0_110, %c0_111] : memref<48x16xf32, #tpu.memory_space<vmem>>, vector<48x16xf32>
    %cst_112 = arith.constant dense<0.000000e+00> : vector<16x16xf32>
    %181 = tpu.matmul %179, %180, %cst_112 {dimension_numbers = #tpu.dot_dimension_numbers<[1], [0], [0], [1], [0, 0, 1, 1], [], []>} : vector<16x48xf32>, vector<48x16xf32>, vector<16x16xf32> -> vector<16x16xf32>
    %cst_113 = arith.constant dense<0.000000e+00> : vector<16x16xf32>
    %182 = tpu.matmul %154, %178, %cst_113 {dimension_numbers = #tpu.dot_dimension_numbers<[1], [0], [0], [1], [0, 0, 1, 1], [], []>} : vector<16x16xf32>, vector<16x16xf32>, vector<16x16xf32> -> vector<16x16xf32>
    %183 = arith.addf %181, %182 : vector<16x16xf32>
    %c0_114 = arith.constant 0 : index
    %c0_115 = arith.constant 0 : index
    %184 = vector.load %arg16[%c0_114, %c0_115] : memref<1x16xf32, #tpu.memory_space<vmem>>, vector<1x16xf32>
    %185 = vector.broadcast %184 : vector<1x16xf32> to vector<16x16xf32>
    %186 = arith.addf %183, %185 : vector<16x16xf32>
    %cst_116 = arith.constant 0.000000e+00 : f32
    %187 = vector.broadcast %cst_116 : f32 to vector<16x16xf32>
    %188 = arith.maximumf %186, %187 : vector<16x16xf32>
    %c0_117 = arith.constant 0 : index
    %c0_118 = arith.constant 0 : index
    %189 = vector.load %arg17[%c0_117, %c0_118] : memref<16x32xf32, #tpu.memory_space<vmem>>, vector<16x32xf32>
    %cst_119 = arith.constant dense<0.000000e+00> : vector<16x32xf32>
    %190 = tpu.matmul %188, %189, %cst_119 {dimension_numbers = #tpu.dot_dimension_numbers<[1], [0], [0], [1], [0, 0, 1, 1], [], []>} : vector<16x16xf32>, vector<16x32xf32>, vector<16x32xf32> -> vector<16x32xf32>
    %191 = vector.extract_strided_slice %190 {offsets = [0, 0], sizes = [16, 16], strides = [1, 1]} : vector<16x32xf32> to vector<16x16xf32>
    %192 = vector.extract_strided_slice %190 {offsets = [0, 16], sizes = [16, 16], strides = [1, 1]} : vector<16x32xf32> to vector<16x16xf32>
    %193 = tpu.concatenate %191, %192 in 0 : vector<16x16xf32>, vector<16x16xf32> -> vector<32x16xf32>
    %194 = tpu.concatenate %173, %172 in 1 : vector<8x32xf32>, vector<8x16xf32> -> vector<8x48xf32>
    %cst_120 = arith.constant dense<0.000000e+00> : vector<8x16xf32>
    %195 = tpu.matmul %168, %193, %cst_120 {dimension_numbers = #tpu.dot_dimension_numbers<[1], [0], [0], [1], [0, 0, 1, 1], [], []>} : vector<8x32xf32>, vector<32x16xf32>, vector<8x16xf32> -> vector<8x16xf32>
    %c0_121 = arith.constant 0 : index
    %c0_122 = arith.constant 0 : index
    %196 = vector.load %arg18[%c0_121, %c0_122] : memref<48x16xf32, #tpu.memory_space<vmem>>, vector<48x16xf32>
    %cst_123 = arith.constant dense<0.000000e+00> : vector<8x16xf32>
    %197 = tpu.matmul %194, %196, %cst_123 {dimension_numbers = #tpu.dot_dimension_numbers<[1], [0], [0], [1], [0, 0, 1, 1], [], []>} : vector<8x48xf32>, vector<48x16xf32>, vector<8x16xf32> -> vector<8x16xf32>
    %198 = arith.addf %195, %197 : vector<8x16xf32>
    %c0_124 = arith.constant 0 : index
    %c0_125 = arith.constant 0 : index
    %199 = vector.load %arg19[%c0_124, %c0_125] : memref<1x16xf32, #tpu.memory_space<vmem>>, vector<1x16xf32>
    %200 = vector.broadcast %199 : vector<1x16xf32> to vector<8x16xf32>
    %201 = arith.addf %198, %200 : vector<8x16xf32>
    %cst_126 = arith.constant 0.000000e+00 : f32
    %202 = vector.broadcast %cst_126 : f32 to vector<8x16xf32>
    %203 = arith.maximumf %201, %202 : vector<8x16xf32>
    %cst_127 = arith.constant dense<0.000000e+00> : vector<16xf32>
    %204 = vector.multi_reduction <add>, %188, %cst_127 [0] : vector<16x16xf32> to vector<16xf32>
    %205 = vector.shape_cast %204 : vector<16xf32> to vector<1x16xf32>
    %cst_128 = arith.constant 6.250000e-02 : f32
    %206 = vector.broadcast %cst_128 : f32 to vector<1x16xf32>
    %207 = arith.mulf %205, %206 : vector<1x16xf32>
    %cst_129 = arith.constant dense<0.000000e+00> : vector<16xf32>
    %208 = vector.multi_reduction <add>, %203, %cst_129 [0] : vector<8x16xf32> to vector<16xf32>
    %209 = vector.shape_cast %208 : vector<16xf32> to vector<1x16xf32>
    %cst_130 = arith.constant 1.250000e-01 : f32
    %210 = vector.broadcast %cst_130 : f32 to vector<1x16xf32>
    %211 = arith.mulf %209, %210 : vector<1x16xf32>
    %212 = tpu.concatenate %211, %207, %105 in 1 : vector<1x16xf32>, vector<1x16xf32>, vector<1x16xf32> -> vector<1x48xf32>
    %c0_131 = arith.constant 0 : index
    %c0_132 = arith.constant 0 : index
    %213 = vector.load %arg20[%c0_131, %c0_132] : memref<48x16xf32, #tpu.memory_space<vmem>>, vector<48x16xf32>
    %cst_133 = arith.constant dense<0.000000e+00> : vector<1x16xf32>
    %214 = tpu.matmul %212, %213, %cst_133 {dimension_numbers = #tpu.dot_dimension_numbers<[1], [0], [0], [1], [0, 0, 1, 1], [], []>} : vector<1x48xf32>, vector<48x16xf32>, vector<1x16xf32> -> vector<1x16xf32>
    %c0_134 = arith.constant 0 : index
    %c0_135 = arith.constant 0 : index
    %215 = vector.load %arg21[%c0_134, %c0_135] : memref<1x16xf32, #tpu.memory_space<vmem>>, vector<1x16xf32>
    %216 = arith.addf %214, %215 : vector<1x16xf32>
    %cst_136 = arith.constant 0.000000e+00 : f32
    %217 = vector.broadcast %cst_136 : f32 to vector<1x16xf32>
    %218 = arith.maximumf %216, %217 : vector<1x16xf32>
    %c0_137 = arith.constant 0 : index
    %c0_138 = arith.constant 0 : index
    %219 = vector.load %arg22[%c0_137, %c0_138] : memref<16x16xf32, #tpu.memory_space<vmem>>, vector<16x16xf32>
    %cst_139 = arith.constant dense<0.000000e+00> : vector<8x16xf32>
    %220 = tpu.matmul %203, %219, %cst_139 {dimension_numbers = #tpu.dot_dimension_numbers<[1], [0], [0], [1], [0, 0, 1, 1], [], []>} : vector<8x16xf32>, vector<16x16xf32>, vector<8x16xf32> -> vector<8x16xf32>
    %c0_140 = arith.constant 0 : index
    %c0_141 = arith.constant 0 : index
    %221 = vector.load %arg23[%c0_140, %c0_141] : memref<1x16xf32, #tpu.memory_space<vmem>>, vector<1x16xf32>
    %222 = vector.broadcast %221 : vector<1x16xf32> to vector<8x16xf32>
    %223 = arith.addf %220, %222 : vector<8x16xf32>
    %cst_142 = arith.constant 0.000000e+00 : f32
    %224 = vector.broadcast %cst_142 : f32 to vector<8x16xf32>
    %225 = arith.maximumf %223, %224 : vector<8x16xf32>
    %c0_143 = arith.constant 0 : index
    %c0_144 = arith.constant 0 : index
    %226 = vector.load %arg24[%c0_143, %c0_144] : memref<16x4xf32, #tpu.memory_space<vmem>>, vector<16x4xf32>
    %cst_145 = arith.constant dense<0.000000e+00> : vector<8x4xf32>
    %227 = tpu.matmul %225, %226, %cst_145 {dimension_numbers = #tpu.dot_dimension_numbers<[1], [0], [0], [1], [0, 0, 1, 1], [], []>} : vector<8x16xf32>, vector<16x4xf32>, vector<8x4xf32> -> vector<8x4xf32>
    %c0_146 = arith.constant 0 : index
    %c0_147 = arith.constant 0 : index
    %228 = vector.load %arg25[%c0_146, %c0_147] : memref<1x4xf32, #tpu.memory_space<vmem>>, vector<1x4xf32>
    %229 = vector.broadcast %228 : vector<1x4xf32> to vector<8x4xf32>
    %230 = arith.addf %227, %229 : vector<8x4xf32>
    %c1_148 = arith.constant 1 : index
    %c0_149 = arith.constant 0 : index
    %c0_150 = arith.constant 0 : index
    %231 = vector.load %arg26[%c1_148, %c0_149, %c0_150] : memref<3x8x4xf32, #tpu.memory_space<vmem>>, vector<1x8x4xf32>
    %232 = vector.shape_cast %231 : vector<1x8x4xf32> to vector<8x4xf32>
    %233 = vector.shape_cast %230 : vector<8x4xf32> to vector<1x8x4xf32>
    tpu.vector_store %arg26[%c1_148, %c0_149, %c0_150], %233 {strides = array<i32>} : memref<3x8x4xf32, #tpu.memory_space<vmem>>, vector<1x8x4xf32>,
    %c2 = arith.constant 2 : index
    %c0_151 = arith.constant 0 : index
    %c0_152 = arith.constant 0 : index
    %234 = vector.load %arg1[%c2, %c0_151, %c0_152] : memref<3x8x8xf32, #tpu.memory_space<vmem>>, vector<1x8x8xf32>
    %235 = vector.shape_cast %234 : vector<1x8x8xf32> to vector<8x8xf32>
    %c0_153 = arith.constant 0 : index
    %c0_154 = arith.constant 0 : index
    %236 = vector.load %arg8[%c0_153, %c0_154] : memref<8x16xf32, #tpu.memory_space<vmem>>, vector<8x16xf32>
    %cst_155 = arith.constant dense<0.000000e+00> : vector<8x16xf32>
    %237 = tpu.matmul %235, %236, %cst_155 {dimension_numbers = #tpu.dot_dimension_numbers<[1], [0], [0], [1], [0, 0, 1, 1], [], []>} : vector<8x8xf32>, vector<8x16xf32>, vector<8x16xf32> -> vector<8x16xf32>
    %c0_156 = arith.constant 0 : index
    %c0_157 = arith.constant 0 : index
    %238 = vector.load %arg9[%c0_156, %c0_157] : memref<1x16xf32, #tpu.memory_space<vmem>>, vector<1x16xf32>
    %239 = vector.broadcast %238 : vector<1x16xf32> to vector<8x16xf32>
    %240 = arith.addf %237, %239 : vector<8x16xf32>
    %cst_158 = arith.constant 0.000000e+00 : f32
    %241 = vector.broadcast %cst_158 : f32 to vector<8x16xf32>
    %242 = arith.maximumf %240, %241 : vector<8x16xf32>
    %c2_159 = arith.constant 2 : index
    %c0_160 = arith.constant 0 : index
    %c0_161 = arith.constant 0 : index
    %243 = vector.load %arg2[%c2_159, %c0_160, %c0_161] : memref<3x16x1xf32, #tpu.memory_space<vmem>>, vector<1x16x1xf32>
    %244 = vector.shape_cast %243 : vector<1x16x1xf32> to vector<16x1xf32>
    %c0_162 = arith.constant 0 : index
    %c0_163 = arith.constant 0 : index
    %245 = vector.load %arg10[%c0_162, %c0_163] : memref<1x16xf32, #tpu.memory_space<vmem>>, vector<1x16xf32>
    %246 = vector.broadcast %244 : vector<16x1xf32> to vector<16x16xf32>
    %247 = vector.broadcast %245 : vector<1x16xf32> to vector<16x16xf32>
    %248 = arith.mulf %246, %247 : vector<16x16xf32>
    %c0_164 = arith.constant 0 : index
    %c0_165 = arith.constant 0 : index
    %249 = vector.load %arg11[%c0_164, %c0_165] : memref<1x16xf32, #tpu.memory_space<vmem>>, vector<1x16xf32>
    %250 = vector.broadcast %249 : vector<1x16xf32> to vector<16x16xf32>
    %251 = arith.addf %248, %250 : vector<16x16xf32>
    %cst_166 = arith.constant 0.000000e+00 : f32
    %252 = vector.broadcast %cst_166 : f32 to vector<16x16xf32>
    %253 = arith.maximumf %251, %252 : vector<16x16xf32>
    %254 = tpu.iota {dimensions = array<i32: 1>} : vector<16x16xi32>
    %c2_167 = arith.constant 2 : index
    %c0_168 = arith.constant 0 : index
    %c0_169 = arith.constant 0 : index
    %255 = vector.load %arg6[%c2_167, %c0_168, %c0_169] : memref<3x16x1xi32, #tpu.memory_space<vmem>>, vector<1x16x1xi32>
    %256 = vector.shape_cast %255 : vector<1x16x1xi32> to vector<16x1xi32>
    %257 = vector.broadcast %256 : vector<16x1xi32> to vector<16x16xi32>
    %258 = arith.cmpi eq, %254, %257 : vector<16x16xi32>
    %c2_170 = arith.constant 2 : index
    %c0_171 = arith.constant 0 : index
    %c0_172 = arith.constant 0 : index
    %259 = vector.load %arg7[%c2_170, %c0_171, %c0_172] : memref<3x16x1xi32, #tpu.memory_space<vmem>>, vector<1x16x1xi32>
    %260 = vector.shape_cast %259 : vector<1x16x1xi32> to vector<16x1xi32>
    %c8_i32_173 = arith.constant 8 : i32
    %261 = vector.broadcast %c8_i32_173 : i32 to vector<16x1xi32>
    %262 = arith.addi %260, %261 : vector<16x1xi32>
    %263 = vector.broadcast %262 : vector<16x1xi32> to vector<16x16xi32>
    %264 = arith.cmpi eq, %254, %263 : vector<16x16xi32>
    %265 = arith.ori %258, %264 : vector<16x16xi1>
    %266 = arith.extui %265 : vector<16x16xi1> to vector<16x16xi32>
    %267 = arith.sitofp %266 : vector<16x16xi32> to vector<16x16xf32>
    %268 = tpu.iota {dimensions = array<i32: 0>} : vector<8x16xi32>
    %c2_174 = arith.constant 2 : index
    %c0_175 = arith.constant 0 : index
    %c0_176 = arith.constant 0 : index
    %269 = vector.load %arg4[%c2_174, %c0_175, %c0_176] : memref<3x1x16xi32, #tpu.memory_space<vmem>>, vector<1x1x16xi32>
    %270 = vector.shape_cast %269 : vector<1x1x16xi32> to vector<1x16xi32>
    %271 = vector.broadcast %270 : vector<1x16xi32> to vector<8x16xi32>
    %272 = arith.cmpi eq, %268, %271 : vector<8x16xi32>
    %273 = arith.extui %272 : vector<8x16xi1> to vector<8x16xi32>
    %274 = arith.sitofp %273 : vector<8x16xi32> to vector<8x16xf32>
    %c2_177 = arith.constant 2 : index
    %c0_178 = arith.constant 0 : index
    %c0_179 = arith.constant 0 : index
    %275 = vector.load %arg5[%c2_177, %c0_178, %c0_179] : memref<3x1x16xi32, #tpu.memory_space<vmem>>, vector<1x1x16xi32>
    %276 = vector.shape_cast %275 : vector<1x1x16xi32> to vector<1x16xi32>
    %277 = vector.broadcast %276 : vector<1x16xi32> to vector<8x16xi32>
    %278 = arith.cmpi eq, %268, %277 : vector<8x16xi32>
    %279 = arith.extui %278 : vector<8x16xi1> to vector<8x16xi32>
    %280 = arith.sitofp %279 : vector<8x16xi32> to vector<8x16xf32>
    %281 = tpu.concatenate %274, %280 in 1 : vector<8x16xf32>, vector<8x16xf32> -> vector<8x32xf32>
    %282 = vector.shape_cast %218 : vector<1x16xf32> to vector<1x16xf32>
    %283 = vector.broadcast %282 : vector<1x16xf32> to vector<16x16xf32>
    %284 = vector.shape_cast %218 : vector<1x16xf32> to vector<1x16xf32>
    %285 = vector.broadcast %284 : vector<1x16xf32> to vector<8x16xf32>
    %286 = tpu.concatenate %242, %203 in 1 : vector<8x16xf32>, vector<8x16xf32> -> vector<8x32xf32>
    %c0_180 = arith.constant 0 : index
    %c0_181 = arith.constant 0 : index
    %287 = vector.load %arg14[%c0_180, %c0_181] : memref<32x32xf32, #tpu.memory_space<vmem>>, vector<32x32xf32>
    %cst_182 = arith.constant dense<0.000000e+00> : vector<8x32xf32>
    %288 = tpu.matmul %286, %287, %cst_182 {dimension_numbers = #tpu.dot_dimension_numbers<[1], [0], [0], [1], [0, 0, 1, 1], [], []>} : vector<8x32xf32>, vector<32x32xf32>, vector<8x32xf32> -> vector<8x32xf32>
    %289 = vector.extract_strided_slice %288 {offsets = [0, 0], sizes = [8, 16], strides = [1, 1]} : vector<8x32xf32> to vector<8x16xf32>
    %290 = vector.extract_strided_slice %288 {offsets = [0, 16], sizes = [8, 16], strides = [1, 1]} : vector<8x32xf32> to vector<8x16xf32>
    %291 = tpu.concatenate %289, %290 in 0 : vector<8x16xf32>, vector<8x16xf32> -> vector<16x16xf32>
    %292 = tpu.concatenate %253, %188, %283 in 1 : vector<16x16xf32>, vector<16x16xf32>, vector<16x16xf32> -> vector<16x48xf32>
    %c0_183 = arith.constant 0 : index
    %c0_184 = arith.constant 0 : index
    %293 = vector.load %arg15[%c0_183, %c0_184] : memref<48x16xf32, #tpu.memory_space<vmem>>, vector<48x16xf32>
    %cst_185 = arith.constant dense<0.000000e+00> : vector<16x16xf32>
    %294 = tpu.matmul %292, %293, %cst_185 {dimension_numbers = #tpu.dot_dimension_numbers<[1], [0], [0], [1], [0, 0, 1, 1], [], []>} : vector<16x48xf32>, vector<48x16xf32>, vector<16x16xf32> -> vector<16x16xf32>
    %cst_186 = arith.constant dense<0.000000e+00> : vector<16x16xf32>
    %295 = tpu.matmul %267, %291, %cst_186 {dimension_numbers = #tpu.dot_dimension_numbers<[1], [0], [0], [1], [0, 0, 1, 1], [], []>} : vector<16x16xf32>, vector<16x16xf32>, vector<16x16xf32> -> vector<16x16xf32>
    %296 = arith.addf %294, %295 : vector<16x16xf32>
    %c0_187 = arith.constant 0 : index
    %c0_188 = arith.constant 0 : index
    %297 = vector.load %arg16[%c0_187, %c0_188] : memref<1x16xf32, #tpu.memory_space<vmem>>, vector<1x16xf32>
    %298 = vector.broadcast %297 : vector<1x16xf32> to vector<16x16xf32>
    %299 = arith.addf %296, %298 : vector<16x16xf32>
    %cst_189 = arith.constant 0.000000e+00 : f32
    %300 = vector.broadcast %cst_189 : f32 to vector<16x16xf32>
    %301 = arith.maximumf %299, %300 : vector<16x16xf32>
    %c0_190 = arith.constant 0 : index
    %c0_191 = arith.constant 0 : index
    %302 = vector.load %arg17[%c0_190, %c0_191] : memref<16x32xf32, #tpu.memory_space<vmem>>, vector<16x32xf32>
    %cst_192 = arith.constant dense<0.000000e+00> : vector<16x32xf32>
    %303 = tpu.matmul %301, %302, %cst_192 {dimension_numbers = #tpu.dot_dimension_numbers<[1], [0], [0], [1], [0, 0, 1, 1], [], []>} : vector<16x16xf32>, vector<16x32xf32>, vector<16x32xf32> -> vector<16x32xf32>
    %304 = vector.extract_strided_slice %303 {offsets = [0, 0], sizes = [16, 16], strides = [1, 1]} : vector<16x32xf32> to vector<16x16xf32>
    %305 = vector.extract_strided_slice %303 {offsets = [0, 16], sizes = [16, 16], strides = [1, 1]} : vector<16x32xf32> to vector<16x16xf32>
    %306 = tpu.concatenate %304, %305 in 0 : vector<16x16xf32>, vector<16x16xf32> -> vector<32x16xf32>
    %307 = tpu.concatenate %286, %285 in 1 : vector<8x32xf32>, vector<8x16xf32> -> vector<8x48xf32>
    %cst_193 = arith.constant dense<0.000000e+00> : vector<8x16xf32>
    %308 = tpu.matmul %281, %306, %cst_193 {dimension_numbers = #tpu.dot_dimension_numbers<[1], [0], [0], [1], [0, 0, 1, 1], [], []>} : vector<8x32xf32>, vector<32x16xf32>, vector<8x16xf32> -> vector<8x16xf32>
    %c0_194 = arith.constant 0 : index
    %c0_195 = arith.constant 0 : index
    %309 = vector.load %arg18[%c0_194, %c0_195] : memref<48x16xf32, #tpu.memory_space<vmem>>, vector<48x16xf32>
    %cst_196 = arith.constant dense<0.000000e+00> : vector<8x16xf32>
    %310 = tpu.matmul %307, %309, %cst_196 {dimension_numbers = #tpu.dot_dimension_numbers<[1], [0], [0], [1], [0, 0, 1, 1], [], []>} : vector<8x48xf32>, vector<48x16xf32>, vector<8x16xf32> -> vector<8x16xf32>
    %311 = arith.addf %308, %310 : vector<8x16xf32>
    %c0_197 = arith.constant 0 : index
    %c0_198 = arith.constant 0 : index
    %312 = vector.load %arg19[%c0_197, %c0_198] : memref<1x16xf32, #tpu.memory_space<vmem>>, vector<1x16xf32>
    %313 = vector.broadcast %312 : vector<1x16xf32> to vector<8x16xf32>
    %314 = arith.addf %311, %313 : vector<8x16xf32>
    %cst_199 = arith.constant 0.000000e+00 : f32
    %315 = vector.broadcast %cst_199 : f32 to vector<8x16xf32>
    %316 = arith.maximumf %314, %315 : vector<8x16xf32>
    %c0_200 = arith.constant 0 : index
    %c0_201 = arith.constant 0 : index
    %317 = vector.load %arg22[%c0_200, %c0_201] : memref<16x16xf32, #tpu.memory_space<vmem>>, vector<16x16xf32>
    %cst_202 = arith.constant dense<0.000000e+00> : vector<8x16xf32>
    %318 = tpu.matmul %316, %317, %cst_202 {dimension_numbers = #tpu.dot_dimension_numbers<[1], [0], [0], [1], [0, 0, 1, 1], [], []>} : vector<8x16xf32>, vector<16x16xf32>, vector<8x16xf32> -> vector<8x16xf32>
    %c0_203 = arith.constant 0 : index
    %c0_204 = arith.constant 0 : index
    %319 = vector.load %arg23[%c0_203, %c0_204] : memref<1x16xf32, #tpu.memory_space<vmem>>, vector<1x16xf32>
    %320 = vector.broadcast %319 : vector<1x16xf32> to vector<8x16xf32>
    %321 = arith.addf %318, %320 : vector<8x16xf32>
    %cst_205 = arith.constant 0.000000e+00 : f32
    %322 = vector.broadcast %cst_205 : f32 to vector<8x16xf32>
    %323 = arith.maximumf %321, %322 : vector<8x16xf32>
    %c0_206 = arith.constant 0 : index
    %c0_207 = arith.constant 0 : index
    %324 = vector.load %arg24[%c0_206, %c0_207] : memref<16x4xf32, #tpu.memory_space<vmem>>, vector<16x4xf32>
    %cst_208 = arith.constant dense<0.000000e+00> : vector<8x4xf32>
    %325 = tpu.matmul %323, %324, %cst_208 {dimension_numbers = #tpu.dot_dimension_numbers<[1], [0], [0], [1], [0, 0, 1, 1], [], []>} : vector<8x16xf32>, vector<16x4xf32>, vector<8x4xf32> -> vector<8x4xf32>
    %c0_209 = arith.constant 0 : index
    %c0_210 = arith.constant 0 : index
    %326 = vector.load %arg25[%c0_209, %c0_210] : memref<1x4xf32, #tpu.memory_space<vmem>>, vector<1x4xf32>
    %327 = vector.broadcast %326 : vector<1x4xf32> to vector<8x4xf32>
    %328 = arith.addf %325, %327 : vector<8x4xf32>
    %c2_211 = arith.constant 2 : index
    %c0_212 = arith.constant 0 : index
    %c0_213 = arith.constant 0 : index
    %329 = vector.load %arg26[%c2_211, %c0_212, %c0_213] : memref<3x8x4xf32, #tpu.memory_space<vmem>>, vector<1x8x4xf32>
    %330 = vector.shape_cast %329 : vector<1x8x4xf32> to vector<8x4xf32>
    %331 = vector.shape_cast %328 : vector<8x4xf32> to vector<1x8x4xf32>
    tpu.vector_store %arg26[%c2_211, %c0_212, %c0_213], %331 {strides = array<i32>} : memref<3x8x4xf32, #tpu.memory_space<vmem>>, vector<1x8x4xf32>,
    return
  }
  func.func @transform_0(%arg0: i32) -> (i32, i32, i32) {
    %c0_i32 = arith.constant 0 : i32
    %c0_i32_0 = arith.constant 0 : i32
    %c0_i32_1 = arith.constant 0 : i32
    %c0_i32_2 = arith.constant 0 : i32
    return %c0_i32, %c0_i32_0, %c0_i32_1 : i32, i32, i32
  }
  func.func @transform_1(%arg0: i32) -> (i32, i32, i32) {
    %c0_i32 = arith.constant 0 : i32
    %c0_i32_0 = arith.constant 0 : i32
    %c0_i32_1 = arith.constant 0 : i32
    %c0_i32_2 = arith.constant 0 : i32
    return %c0_i32, %c0_i32_0, %c0_i32_1 : i32, i32, i32
  }
  func.func @transform_2(%arg0: i32) -> (i32, i32) {
    %c0_i32 = arith.constant 0 : i32
    %c0_i32_0 = arith.constant 0 : i32
    %c0_i32_1 = arith.constant 0 : i32
    return %c0_i32, %c0_i32_0 : i32, i32
  }
  func.func @transform_3(%arg0: i32) -> (i32, i32, i32) {
    %c0_i32 = arith.constant 0 : i32
    %c0_i32_0 = arith.constant 0 : i32
    %c0_i32_1 = arith.constant 0 : i32
    %c0_i32_2 = arith.constant 0 : i32
    return %c0_i32, %c0_i32_0, %c0_i32_1 : i32, i32, i32
  }
  func.func @transform_4(%arg0: i32) -> (i32, i32, i32) {
    %c0_i32 = arith.constant 0 : i32
    %c0_i32_0 = arith.constant 0 : i32
    %c0_i32_1 = arith.constant 0 : i32
    %c0_i32_2 = arith.constant 0 : i32
    return %c0_i32, %c0_i32_0, %c0_i32_1 : i32, i32, i32
  }
  func.func @transform_5(%arg0: i32) -> (i32, i32, i32) {
    %c0_i32 = arith.constant 0 : i32
    %c0_i32_0 = arith.constant 0 : i32
    %c0_i32_1 = arith.constant 0 : i32
    %c0_i32_2 = arith.constant 0 : i32
    return %c0_i32, %c0_i32_0, %c0_i32_1 : i32, i32, i32
  }
  func.func @transform_6(%arg0: i32) -> (i32, i32, i32) {
    %c0_i32 = arith.constant 0 : i32
    %c0_i32_0 = arith.constant 0 : i32
    %c0_i32_1 = arith.constant 0 : i32
    %c0_i32_2 = arith.constant 0 : i32
    return %c0_i32, %c0_i32_0, %c0_i32_1 : i32, i32, i32
  }
  func.func @transform_7(%arg0: i32) -> (i32, i32) {
    %c0_i32 = arith.constant 0 : i32
    %c0_i32_0 = arith.constant 0 : i32
    %c0_i32_1 = arith.constant 0 : i32
    return %c0_i32, %c0_i32_0 : i32, i32
  }
  func.func @transform_8(%arg0: i32) -> (i32, i32) {
    %c0_i32 = arith.constant 0 : i32
    %c0_i32_0 = arith.constant 0 : i32
    %c0_i32_1 = arith.constant 0 : i32
    return %c0_i32, %c0_i32_0 : i32, i32
  }
  func.func @transform_9(%arg0: i32) -> (i32, i32) {
    %c0_i32 = arith.constant 0 : i32
    %c0_i32_0 = arith.constant 0 : i32
    %c0_i32_1 = arith.constant 0 : i32
    return %c0_i32, %c0_i32_0 : i32, i32
  }
  func.func @transform_10(%arg0: i32) -> (i32, i32) {
    %c0_i32 = arith.constant 0 : i32
    %c0_i32_0 = arith.constant 0 : i32
    %c0_i32_1 = arith.constant 0 : i32
    return %c0_i32, %c0_i32_0 : i32, i32
  }
  func.func @transform_11(%arg0: i32) -> (i32, i32) {
    %c0_i32 = arith.constant 0 : i32
    %c0_i32_0 = arith.constant 0 : i32
    %c0_i32_1 = arith.constant 0 : i32
    return %c0_i32, %c0_i32_0 : i32, i32
  }
  func.func @transform_12(%arg0: i32) -> (i32, i32) {
    %c0_i32 = arith.constant 0 : i32
    %c0_i32_0 = arith.constant 0 : i32
    %c0_i32_1 = arith.constant 0 : i32
    return %c0_i32, %c0_i32_0 : i32, i32
  }
  func.func @transform_13(%arg0: i32) -> (i32, i32) {
    %c0_i32 = arith.constant 0 : i32
    %c0_i32_0 = arith.constant 0 : i32
    %c0_i32_1 = arith.constant 0 : i32
    return %c0_i32, %c0_i32_0 : i32, i32
  }
  func.func @transform_14(%arg0: i32) -> (i32, i32) {
    %c0_i32 = arith.constant 0 : i32
    %c0_i32_0 = arith.constant 0 : i32
    %c0_i32_1 = arith.constant 0 : i32
    return %c0_i32, %c0_i32_0 : i32, i32
  }
  func.func @transform_15(%arg0: i32) -> (i32, i32) {
    %c0_i32 = arith.constant 0 : i32
    %c0_i32_0 = arith.constant 0 : i32
    %c0_i32_1 = arith.constant 0 : i32
    return %c0_i32, %c0_i32_0 : i32, i32
  }
  func.func @transform_16(%arg0: i32) -> (i32, i32) {
    %c0_i32 = arith.constant 0 : i32
    %c0_i32_0 = arith.constant 0 : i32
    %c0_i32_1 = arith.constant 0 : i32
    return %c0_i32, %c0_i32_0 : i32, i32
  }
  func.func @transform_17(%arg0: i32) -> (i32, i32) {
    %c0_i32 = arith.constant 0 : i32
    %c0_i32_0 = arith.constant 0 : i32
    %c0_i32_1 = arith.constant 0 : i32
    return %c0_i32, %c0_i32_0 : i32, i32
  }
  func.func @transform_18(%arg0: i32) -> (i32, i32) {
    %c0_i32 = arith.constant 0 : i32
    %c0_i32_0 = arith.constant 0 : i32
    %c0_i32_1 = arith.constant 0 : i32
    return %c0_i32, %c0_i32_0 : i32, i32
  }
  func.func @transform_19(%arg0: i32) -> (i32, i32) {
    %c0_i32 = arith.constant 0 : i32
    %c0_i32_0 = arith.constant 0 : i32
    %c0_i32_1 = arith.constant 0 : i32
    return %c0_i32, %c0_i32_0 : i32, i32
  }
  func.func @transform_20(%arg0: i32) -> (i32, i32) {
    %c0_i32 = arith.constant 0 : i32
    %c0_i32_0 = arith.constant 0 : i32
    %c0_i32_1 = arith.constant 0 : i32
    return %c0_i32, %c0_i32_0 : i32, i32
  }
  func.func @transform_21(%arg0: i32) -> (i32, i32) {
    %c0_i32 = arith.constant 0 : i32
    %c0_i32_0 = arith.constant 0 : i32
    %c0_i32_1 = arith.constant 0 : i32
    return %c0_i32, %c0_i32_0 : i32, i32
  }
  func.func @transform_22(%arg0: i32) -> (i32, i32) {
    %c0_i32 = arith.constant 0 : i32
    %c0_i32_0 = arith.constant 0 : i32
    %c0_i32_1 = arith.constant 0 : i32
    return %c0_i32, %c0_i32_0 : i32, i32
  }
  func.func @transform_23(%arg0: i32) -> (i32, i32) {
    %c0_i32 = arith.constant 0 : i32
    %c0_i32_0 = arith.constant 0 : i32
    %c0_i32_1 = arith.constant 0 : i32
    return %c0_i32, %c0_i32_0 : i32, i32
  }
  func.func @transform_24(%arg0: i32) -> (i32, i32) {
    %c0_i32 = arith.constant 0 : i32
    %c0_i32_0 = arith.constant 0 : i32
    %c0_i32_1 = arith.constant 0 : i32
    return %c0_i32, %c0_i32_0 : i32, i32
  }
  func.func @transform_25(%arg0: i32) -> (i32, i32, i32) {
    %c0_i32 = arith.constant 0 : i32
    %c0_i32_0 = arith.constant 0 : i32
    %c0_i32_1 = arith.constant 0 : i32
    %c0_i32_2 = arith.constant 0 : i32
    return %c0_i32, %c0_i32_0, %c0_i32_1 : i32, i32, i32
  }
}

</mosaic_0001>

<bundles_post_ra>
// kernel: _ablation_1_core.1
= control target key start
LH: loop header
LB: loop body
LE: loop exit
PB: predicated region body
PF: predicated region fallthrough
CT: control target
= control target key end

     0   :  { %vm106_vm0 = vcmask 64512   ;;  %v3465_v0 = vmov 0.0   ;;  %vm3466_vm1 = vmmov 0   ;;  %v3467_v4 = vmov 0   ;;  %s4377_s28 = smov 16   ;;  %s4342_s7 = inlined_call_operand.vmem [shape: f32[8,16], index: 7, kind: input, shape index: {}]   ;;  %s4343_s0 = inlined_call_operand.vmem [shape: f32[3,8,8], index: 0, kind: input, shape index: {}]   ;;  %s4344_s2 = inlined_call_operand.<no memory space> [shape: f32[1,1], index: 2, kind: input, shape index: {}]   ;;  %s4345_s1 = inlined_call_operand.vmem [shape: f32[3,16,1], index: 1, kind: input, shape index: {}]   ;;  %s4346_s13 = inlined_call_operand.vmem [shape: f32[32,32], index: 13, kind: input, shape index: {}]   ;;  %s4347_s8 = inlined_call_operand.vmem [shape: f32[1,16], index: 8, kind: input, shape index: {}]   ;;  %s4348_s6 = inlined_call_operand.vmem [shape: s32[3,16,1], index: 6, kind: input, shape index: {}]   ;;  %s4349_s9 = inlined_call_operand.vmem [shape: f32[1,16], index: 9, kind: input, shape index: {}]   ;;  %s4350_s10 = inlined_call_operand.vmem [shape: f32[1,16], index: 10, kind: input, shape index: {}]   ;;  %s4351_s5 = inlined_call_operand.vmem [shape: s32[3,16,1], index: 5, kind: input, shape index: {}]   ;;  %s4352_s11 = inlined_call_operand.vmem [shape: f32[1,16], index: 11, kind: input, shape index: {}]   ;;  %s4353_s12 = inlined_call_operand.vmem [shape: f32[1,16], index: 12, kind: input, shape index: {}]   ;;  %s4354_s14 = inlined_call_operand.vmem [shape: f32[48,16], index: 14, kind: input, shape index: {}]   ;;  %s4355_s16 = inlined_call_operand.vmem [shape: f32[16,32], index: 16, kind: input, shape index: {}]   ;;  %s4356_s15 = inlined_call_operand.vmem [shape: f32[1,16], index: 15, kind: input, shape index: {}]   ;;  %s4357_s17 = inlined_call_operand.vmem [shape: f32[48,16], index: 17, kind: input, shape index: {}]   ;;  %s4358_s4 = inlined_call_operand.vmem [shape: s32[3,1,16], index: 4, kind: input, shape index: {}]   ;;  %s4359_s3 = inlined_call_operand.vmem [shape: s32[3,1,16], index: 3, kind: input, shape index: {}]   ;;  %s4360_s21 = inlined_call_operand.vmem [shape: f32[16,16], index: 21, kind: input, shape index: {}]   ;;  %s4361_s19 = inlined_call_operand.vmem [shape: f32[48,16], index: 19, kind: input, shape index: {}]   ;;  %s4362_s18 = inlined_call_operand.vmem [shape: f32[1,16], index: 18, kind: input, shape index: {}]   ;;  %s4363_s23 = inlined_call_operand.vmem [shape: f32[16,4], index: 23, kind: input, shape index: {}]   ;;  %s4364_s22 = inlined_call_operand.vmem [shape: f32[1,16], index: 22, kind: input, shape index: {}]   ;;  %s4365_s20 = inlined_call_operand.vmem [shape: f32[1,16], index: 20, kind: input, shape index: {}]   ;;  %s4366_s24 = inlined_call_operand.vmem [shape: f32[1,4], index: 24, kind: input, shape index: {}]   ;;  %s4367_s25 = inlined_call_operand.vmem [shape: f32[3,8,4], index: 25, kind: output, shape index: {}]  }
   0x1   :  { %4379 = sst [smem:[#allocation3_spill]] %s4342_s7  ;;  %3170 = vmatprep.subr.mxu0 %v3465_v0  ;;  %3172 = vmatprep.mubr.msk.f32.mxu0 %vm3466_vm1, %v3465_v0  ;;  %vm265_vm2 = vcmask 130048   ;;  %vm281_vm3 = vcmask 261120   ;;  %v89_v31 = vlaneseq  ;;  %v83_v34 = vld [vmem:[%s4352_s11] sm:$0x1]  ;;  %s3470_s11 = smov 112  }
   0x2   :  { %4380 = sst [smem:[#allocation4_spill]] %s4343_s0  ;;  %3175 = vmatprep.subr.mxu1 %v3465_v0  ;;  %3183 = vmatprep.mubr.msk.f32.mxu1 %vm3466_vm1, %v3465_v0  ;;  %v94_v37 = vld [vmem:[%s4353_s12] sm:$0x1]  ;;  %v3720_v57 = vld [vmem:[%s4354_s14 + $0x28] sm:$0xff]  ;;  %vm461_vm10 = vcmask 392192   ;;  %v3739_v62 = vld [vmem:[%s4354_s14 + $0x18] sm:$0xff] }
   0x3   :  { %4381 = sst [smem:[#allocation5_spill]] %s4344_s2  ;;  %3462 = vset.pattern.permute.xlu1 %v3467_v4  ;;  %3461 = vset.pattern.permute.xlu0 %v3467_v4  ;;  %v3690_v32 = vshrl.u32 %v89_v31, 7  ;;  %v3702_v40 = vand.u32 127, %v89_v31  ;;  %v3728_v60 = vld [vmem:[%s4354_s14 + $0x20] sm:$0xff]  ;;  %v3746_v63 = vld [vmem:[%s4354_s14 + $0x10] sm:$0xff] }
   0x4   :  { %4382 = sst [smem:[#allocation6_spill]] %s4345_s1  ;;  %v3760_v4 = vld [vmem:[%s4354_s14] sm:$0xff]  ;;  %v3827_v31 = vld [vmem:[%s4357_s17 + $0x10] sm:$0xff] }
   0x5   :  { %4383 = sst [smem:[#allocation7_spill]] %s4346_s13  ;;  %v3693_v33 = vsub.s32 0, %v3690_v32 }
   0x6   :  { %4384 = sst [smem:[#allocation8_spill]] %s4347_s8 }
   0x7   :  { %4385 = sst [smem:[#allocation9_spill]] %s4348_s6 }
   0x8   :  { %4386 = sst [smem:[#allocation10_spill]] %s4349_s9 }
   0x9   :  { %4387 = sst [smem:[#allocation11_spill]] %s4350_s10 }
   0xa   :  { %4388 = sst [smem:[#allocation12_spill]] %s4351_s5 }
   0xb   :  { %s4389_s7 = sld [smem:[#allocation3_spill]] }
   0xc   :  { %s4390_s1 = sld [smem:[#allocation4_spill]] }
   0xd   :  { %s4391_s10 = sld [smem:[#allocation5_spill]] }
   0xe   :  { %s4392_s13 = sld [smem:[#allocation6_spill]] }
   0xf   :  { %s4393_s2 = sld [smem:[#allocation7_spill]] }
  0x10   :  { %s4394_s5 = sld [smem:[#allocation8_spill]] }
  0x11   :  { %v3605_v1 = vld [vmem:[%s4389_s7] sm:$0xff]  ;;  %s4395_s29 = sld [smem:[#allocation9_spill]] }
  0x12   :  { %v97_v2 = vld [vmem:[%s4390_s1] sm:$0xff]  ;;  %3171 = vmatpush3.msra.mxu0 %v3605_v1  ;;  %s4396_s26 = sld [smem:[#allocation10_spill]] }
  0x13   :  { %3173 = vmatmul.mubr.msk.f32.vlgmr.msra.gmra.mxu0 %vm106_vm0, %v97_v2  ;;  %v30_v3 = vstv %s4391_s10  ;;  %s4398_s0 = sld [smem:[#allocation12_spill]]  ;;  %s4399_s10 = smov 16  }
  0x14   :  { %31 = vst [vmem:[#allocation2] sm:$0x1] %v30_v3  ;;  %v181_v5 = vld [vmem:[%s4392_s13] sm:$0xff]  ;;  %v182_v25 = vld [vmem:[%s4392_s13 + $0x8] sm:$0xff]  ;;  %s4400_s12 = sld [smem:[#allocation8_spill]] }
  0x15   :  { %186 = vperm.xlu1 %3462, %v181_v5   ;;  %v3626_v6 = vld [vmem:[%s4393_s2 + $0x18] sm:$0xff]  ;;  %v3631_v7 = vld [vmem:[%s4393_s2 + $0x10] sm:$0xff]  ;;  %v3638_v8 = vld [vmem:[%s4393_s2 + $0x8] sm:$0xff] }
  0x16   :  { %3176 = vmatpush3.msra.mxu1 %v3626_v6  ;;  %v3647_v9 = vld [vmem:[%s4393_s2] sm:$0xff]  ;;  %v3753_v3 = vld [vmem:[%s4354_s14 + $0x8] sm:$0xff] }
  0x17   :  { %3177 = vmatprep.subr.mxu1 %v3465_v0  ;;  %v3653_v10 = vld [vmem:[%s4394_s5] ss:$0 sm:$0xff]  ;;  %v226_v21 = vld [vmem:[%s4395_s29 + $0x8] sm:$0xff]  ;;  %s4397_s5 = sld [smem:[#allocation11_spill]] }
  0x18   :  { %3178 = vmatpush3.msra.mxu1 %v3631_v7  ;;  %v225_v16 = vld [vmem:[%s4395_s29] sm:$0xff]  ;;  %v228_v23 = vadd.s32 8, %v226_v21 }
  0x19   :  { %3179 = vmatprep.subr.mxu1 %v3465_v0  ;;  %v3663_v17 = vld [vmem:[%s4396_s26] ss:$0 sm:$0xff]  ;;  %v227_v19 = vadd.s32 8, %v225_v16  ;;  %191 = vperm.xlu1 %3462, %v182_v25   ;;  %v216_v28 = vld [vmem:[%s4398_s0 + $0x8] sm:$0xff] }
  0x1a   :  { %3180 = vmatpush3.msra.mxu1 %v3638_v8  ;;  %v215_v27 = vld [vmem:[%s4398_s0] sm:$0xff] }
  0x1b   :  { %3181 = vmatprep.subr.mxu1 %v3465_v0  ;;  %v82_v15 = vld [vmem:[#allocation2] sm:$0x1] }
  0x1c   :  { %3182 = vmatpush3.msra.mxu1 %v3647_v9 }
  0x1d   :  { %v3672_v22 = vld [vmem:[%s4397_s5] ss:$0 sm:$0xff]  ;;  %218 = vperm.xlu1 %3462, %v215_v27   ;;  %v3802_v27 = vld [vmem:[%s4357_s17 + $0x28] sm:$0xff] }
  0x21   :  { %221 = vperm.xlu1 %3462, %v216_v28   ;;  %v3811_v28 = vld [vmem:[%s4357_s17 + $0x20] sm:$0xff] }
  0x90   :  { %v187_v18 = vpop.permute.xlu1 %186 }
  0x91   :  { %v200_v20 = vmul.f32 %v3663_v17, %v187_v18 }
  0x93   :  { %v209_v24 = vadd.f32 %v3672_v22, %v200_v20 }
  0x94   :  { %v192_v42 = vpop.permute.xlu1 %191 }
  0x95   :  { %v211_v26 = vmax.f32 %v209_v24, 0.0  ;;  %v201_v47 = vmul.f32 %v3663_v17, %v192_v42 }
  0x97   :  { %v210_v48 = vadd.f32 %v3672_v22, %v201_v47 }
  0x98   :  { %v219_v45 = vpop.permute.xlu1 %218 }
  0x99   :  { %vm223_vm5 = vcmp.eq.s32.totalorder %v3702_v40, %v219_v45  ;;  %v212_v50 = vmax.f32 %v210_v48, 0.0 }
  0x9c   :  { %v222_v53 = vpop.permute.xlu1 %221 }
  0x9d   :  { %vm224_vm8 = vcmp.eq.s32.totalorder %v3702_v40, %v222_v53  ;;  %v2970_v53 = vld [vmem:[%s4398_s0 + $0x18] sm:$0xff] }
  0xd3   :  { %v176_v11 = vpop.f32.mrf.mxu0 }
  0xd4   :  { %v177_v12 = vadd.f32 %v3653_v10, %v176_v11 }
  0xd5   :  { %v3174_v13 = vpop.f32.mrf.mxu0 }
  0xd6   :  { %v180_v14 = vmax.f32 %v177_v12, 0.0  ;;  %v3776_v12 = vld [vmem:[%s4355_s16 + $0x8] sm:$0xff]  ;;  %v3783_v13 = vld [vmem:[%s4355_s16] sm:$0xff] }
  0xd7   :  { %3208 = vmatprep.subr.mxu1 %v3776_v12 }
  0xd8   :  { %273 = vrot.lane.b32.xlu0 %v180_v14, %s4377_s28  ;;  %s3469_s28 = smov 32  }
  0xdc   :  { %86 = vperm.xlu0 %3461, %v82_v15  }
  0xe0   :  { %230 = vperm.xlu0 %3461, %v227_v19   ;;  %v3791_v19 = vld [vmem:[%s4356_s15] ss:$0 sm:$0xff] }
  0xe4   :  { %233 = vperm.xlu0 %3461, %v228_v23  }
  0xe8   :  { %361 = vrot.lane.b32.xlu0 %v211_v26, %s4399_s10 }
 0x14a   :  { %v274_v29 = vpop.permute.xlu0 %273 }
 0x14b   :  { %v3686_v30 = vsel %vm265_vm2, %v180_v14, %v274_v29  ;;  %v3820_v29 = vld [vmem:[%s4357_s17 + $0x18] sm:$0xff] }
 0x14c   :  { %3184 = vmatmul.mubr.msk.f32.vlgmr.msra.gmra.mxu1 %vm281_vm3, %v3686_v30 }
 0x14d   :  { %3209 = vmatpush3.msra.mxu1 %v3776_v12 }
 0x14e   :  { %3210 = vmatprep.subr.mxu1 %v3783_v13 }
 0x14f   :  { %3211 = vmatpush3.msra.mxu1 %v3783_v13 }
 0x150   :  { %3215 = vmatprep.subr.mxu1 %v3465_v0 }
 0x157   :  { %v87_v35 = vpop.permute.xlu0 %86 }
 0x158   :  { %v92_v36 = vrot.slane %v87_v35, %v3693_v33  ;;  %v3841_v35 = vld [vmem:[%s4357_s17] sm:$0xff] }
 0x15a   :  { %v93_v38 = vmul.f32 %v92_v36, %v83_v34  ;;  %v3834_v34 = vld [vmem:[%s4357_s17 + $0x8] sm:$0xff] }
 0x15b   :  { %v231_v44 = vpop.permute.xlu0 %230 }
 0x15c   :  { %v95_v39 = vadd.f32 %v94_v37, %v93_v38  ;;  %vm235_vm4 = vcmp.eq.s32.totalorder %v3702_v40, %v231_v44 }
 0x15d   :  { %vm237_vm6 = vmor %vm223_vm5, %vm235_vm4  ;;  %vm1077_vm4 = vcmask 31744  }
 0x15e   :  { %v96_v41 = vmax.f32 %v95_v39, 0.0  ;;  %v2940_v46 = vsel %vm237_vm6, 1.0, %v3465_v0 }
 0x15f   :  { %3190 = vmatprep.mubr.msk.f32.mxu0 %vm265_vm2, %v2940_v46  ;;  %v234_v52 = vpop.permute.xlu0 %233 }
 0x160   :  { %v271_v43 = vrot.slane %v96_v41, %v3693_v33  ;;  %vm236_vm7 = vcmp.eq.s32.totalorder %v3702_v40, %v234_v52 }
 0x161   :  { %vm238_vm9 = vmor %vm224_vm8, %vm236_vm7 }
 0x162   :  { %367 = vrot.lane.b32.xlu0 %v271_v43, %s3469_s28  ;;  %v2941_v59 = vsel %vm238_vm9, 1.0, %v3465_v0 }
 0x163   :  { %v362_v54 = vpop.permute.xlu0 %361 }
 0x164   :  { %v370_v56 = vsel %vm265_vm2, %v211_v26, %v362_v54 }
 0x1d4   :  { %v3722_v58 = vpop.permute.xlu0 %367 }
 0x1d5   :  { %v372_v61 = vsel %vm281_vm3, %v370_v56, %v3722_v58  ;;  %v645_v36 = vsel %vm281_vm3, %v3686_v30, %v3722_v58  ;;  %v2944_v30 = vld [vmem:[%s4358_s4] ss:$0 sm:$0xff] }
 0x1d6   :  { %vm258_vm11 = vcmp.eq.s32.totalorder %v3690_v32, %v2944_v30 }
 0x20c   :  { %v351_v49 = vpop.f32.mrf.mxu1 }
 0x20d   :  { %356 = vrot.lane.b32.xlu1 %v351_v49, %s3470_s11 }
 0x20e   :  { %v3185_v51 = vpop.f32.mrf.mxu1 }
 0x20f   :  { %v2969_v51 = vld [vmem:[%s4398_s0 + $0x10] sm:$0xff] }
 0x211   :  { %363 = vrot.lane.b32.xlu1 %v212_v50, %s4399_s10 }
 0x27f   :  { %v357_v55 = vpop.permute.xlu1 %356 }
 0x280   :  { %3186 = vmatprep.subr.mxu0 %v357_v55 }
 0x281   :  { %3187 = vmatpush3.msra.mxu0 %v357_v55  ;;  %v2942_v55 = vld [vmem:[%s4359_s3] ss:$0 sm:$0xff] }
 0x282   :  { %3188 = vmatprep.subr.mxu0 %v351_v49  ;;  %vm250_vm12 = vcmp.eq.s32.totalorder %v3690_v32, %v2942_v55 }
 0x283   :  { %3189 = vmatpush3.msra.mxu0 %v351_v49  ;;  %v364_v2 = vpop.permute.xlu1 %363  ;;  %v2945_v49 = vsel %vm258_vm11, 1.0, %v3465_v0 }
 0x284   :  { %3191 = vmatmul.mubr.msk.f32.vlgmr.msra.gmra.mxu0 %vm265_vm2, %v2941_v59  ;;  %3193 = vmatprep.subr.mxu0 %v3720_v57  ;;  %v371_v5 = vsel %vm265_vm2, %v212_v50, %v364_v2 }
 0x285   :  { %3194 = vmatpush3.msra.mxu0 %v3720_v57  ;;  %3205 = vmatprep.mubr.msk.f32.mxu0 %vm461_vm10, %v372_v61  ;;  %v373_v11 = vsel %vm281_vm3, %v371_v5, %v3722_v58  ;;  %v2943_v61 = vsel %vm250_vm12, 1.0, %v3465_v0 }
 0x286   :  { %3195 = vmatprep.subr.mxu0 %v3728_v60 }
 0x287   :  { %3196 = vmatpush3.msra.mxu0 %v3728_v60 }
 0x288   :  { %3197 = vmatprep.subr.mxu0 %v3739_v62 }
 0x289   :  { %3198 = vmatpush3.msra.mxu0 %v3739_v62 }
 0x28a   :  { %3199 = vmatprep.subr.mxu0 %v3746_v63 }
 0x28b   :  { %3200 = vmatpush3.msra.mxu0 %v3746_v63 }
 0x28c   :  { %3201 = vmatprep.subr.mxu0 %v3753_v3 }
 0x28d   :  { %3202 = vmatpush3.msra.mxu0 %v3753_v3 }
 0x28e   :  { %3203 = vmatprep.subr.mxu0 %v3760_v4 }
 0x28f   :  { %3204 = vmatpush3.msra.mxu0 %v3760_v4 }
 0x290   :  { %3206 = vmatmul.mubr.msk.f32.vlgmr.msra.gmra.mxu0 %vm461_vm10, %v373_v11  ;;  %3230 = vmatprep.subr.mxu0 %v3465_v0  ;;  %v3888_v11 = vld [vmem:[%s4360_s21 + $0x8] sm:$0xff] }
 0x291   :  { %3238 = vmatprep.mubr.msk.f32.mxu0 %vm3466_vm1, %v3465_v0 }
 0x344   :  { %v3192_v14 = vpop.f32.mrf.mxu0 }
 0x346   :  { %v452_v15 = vpop.f32.mrf.mxu0 }
 0x350   :  { %v3207_v16 = vpop.f32.mrf.mxu0 }
 0x351   :  { %v540_v18 = vadd.f32 %v3207_v16, %v3192_v14  ;;  %v3895_v14 = vld [vmem:[%s4360_s21] sm:$0xff] }
 0x352   :  { %v534_v20 = vpop.f32.mrf.mxu0  ;;  %v3909_v16 = vld [vmem:[%s4361_s19 + $0x20] sm:$0xff] }
 0x353   :  { %v535_v21 = vadd.f32 %v534_v20, %v452_v15  ;;  %v551_v23 = vadd.f32 %v3791_v19, %v540_v18  ;;  %v3902_v15 = vld [vmem:[%s4361_s19 + $0x28] sm:$0xff]  ;;  %v3916_v18 = vld [vmem:[%s4361_s19 + $0x18] sm:$0xff]  ;;  %v3922_v20 = vld [vmem:[%s4361_s19 + $0x10] sm:$0xff] }
 0x355   :  { %v550_v24 = vadd.f32 %v3791_v19, %v535_v21  ;;  %v3797_v26 = vmax.f32 %v551_v23, 0.0  ;;  %v3928_v21 = vld [vmem:[%s4361_s19 + $0x8] sm:$0xff]  ;;  %v3935_v23 = vld [vmem:[%s4361_s19] sm:$0xff] }
 0x357   :  { %v3795_v25 = vmax.f32 %v550_v24, 0.0  ;;  %v808_v38 = vsel %vm265_vm2, %v3797_v26, 0.0 }
 0x359   :  { %3212 = vmatprep.mubr.msk.f32.mxu1 %vm265_vm2, %v3795_v25  ;;  %v807_v37 = vsel %vm265_vm2, %v3795_v25, 0.0 }
 0x35a   :  { %3213 = vmatmul.mubr.msk.f32.vlgmr.msra.gmra.mxu1 %vm265_vm2, %v3797_v26  ;;  %v809_v39 = vadd.f32 %v808_v38, %v807_v37 }
 0x35b   :  { %3216 = vmatpush3.msra.mxu1 %v3802_v27  ;;  %3227 = vmatprep.mubr.msk.f32.mxu1 %vm3466_vm1, %v3465_v0 }
 0x35c   :  { %3217 = vmatprep.subr.mxu1 %v3465_v0  ;;  %v810_v41 = vrot.slane %v809_v39, 4 }
 0x35d   :  { %3218 = vmatpush3.msra.mxu1 %v3811_v28 }
 0x35e   :  { %3219 = vmatprep.subr.mxu1 %v3465_v0  ;;  %v811_v42 = vadd.f32 %v810_v41, %v809_v39  ;;  %v2971_v41 = vld [vmem:[%s4395_s29 + $0x10] sm:$0xff] }
 0x35f   :  { %3220 = vmatpush3.msra.mxu1 %v3820_v29 }
 0x360   :  { %3221 = vmatprep.subr.mxu1 %v3465_v0  ;;  %v812_v43 = vrot.slane %v811_v42, 2 }
 0x361   :  { %3222 = vmatpush3.msra.mxu1 %v3827_v31 }
 0x362   :  { %3223 = vmatprep.subr.mxu1 %v3465_v0  ;;  %v813_v44 = vadd.f32 %v812_v43, %v811_v42 }
 0x363   :  { %3224 = vmatpush3.msra.mxu1 %v3834_v34 }
 0x364   :  { %3225 = vmatprep.subr.mxu1 %v3465_v0  ;;  %v814_v45 = vrot.slane %v813_v44, 1 }
 0x365   :  { %3226 = vmatpush3.msra.mxu1 %v3841_v35 }
 0x366   :  { %3228 = vmatmul.mubr.msk.f32.vlgmr.msra.gmra.mxu1 %vm461_vm10, %v645_v36  ;;  %3241 = vmatprep.subr.mxu1 %v3465_v0  ;;  %v815_v47 = vadd.f32 %v814_v45, %v813_v44  ;;  %v3944_v36 = vld [vmem:[%s4362_s18] ss:$0 sm:$0xff]  ;;  %v1210_v44 = vadd.s32 8, %v2971_v41  ;;  %v2972_v45 = vld [vmem:[%s4395_s29 + $0x18] sm:$0xff] }
 0x367   :  { %3253 = vmatprep.mubr.msk.f32.mxu1 %vm3466_vm1, %v3465_v0  ;;  %3242 = vmatpush3.msra.mxu1 %v3902_v15 }
 0x368   :  { %v816_v50 = vmul.f32 0.0625, %v815_v47  ;;  %3243 = vmatprep.subr.mxu1 %v3465_v0  ;;  %v1211_v47 = vadd.s32 8, %v2972_v45 }
 0x369   :  { %3244 = vmatpush3.msra.mxu1 %v3909_v16 }
 0x36a   :  { %3245 = vmatprep.subr.mxu1 %v3465_v0 }
 0x36b   :  { %3246 = vmatpush3.msra.mxu1 %v3916_v18 }
 0x36c   :  { %3247 = vmatprep.subr.mxu1 %v3465_v0 }
 0x36d   :  { %3248 = vmatpush3.msra.mxu1 %v3922_v20 }
 0x36e   :  { %3249 = vmatprep.subr.mxu1 %v3465_v0 }
 0x36f   :  { %3250 = vmatpush3.msra.mxu1 %v3928_v21 }
 0x370   :  { %3251 = vmatprep.subr.mxu1 %v3465_v0 }
 0x371   :  { %3252 = vmatpush3.msra.mxu1 %v3935_v23 }
 0x372   :  { %3275 = vmatprep.subr.mxu1 %v3465_v0 }
 0x41a   :  { %v3214_v46 = vpop.f32.mrf.mxu1 }
 0x41b   :  { %641 = vrot.lane.b32.xlu1 %v3214_v46, %s3470_s11 }
 0x41c   :  { %v628_v48 = vpop.f32.mrf.mxu1 }
 0x41d   :  { %639 = vrot.lane.b32.xlu0 %v628_v48, %s3470_s11 }
 0x41f   :  { %262 = vrot.lane.b32.xlu1 %v2945_v49, %s4399_s10 }
 0x421   :  { %826 = vrot.lane.b32.xlu0 %v816_v50, %s4399_s10 }
 0x425   :  { %1200 = vperm.xlu0 %3461, %v2969_v51   ;;  %v2965_v51 = vld [vmem:[%s4392_s13 + $0x10] sm:$0xff] }
 0x426   :  { %v721_v52 = vpop.f32.mrf.mxu1 }
 0x428   :  { %v3229_v54 = vpop.f32.mrf.mxu1 }
 0x429   :  { %1203 = vperm.xlu0 %3461, %v2970_v53  }
 0x48d   :  { %v642_v56 = vpop.permute.xlu1 %641 }
 0x48e   :  { %3231 = vmatpush3.msra.mxu0 %v642_v56 }
 0x48f   :  { %3232 = vmatprep.subr.mxu0 %v3465_v0  ;;  %v640_v59 = vpop.permute.xlu0 %639 }
 0x490   :  { %3233 = vmatpush3.msra.mxu0 %v640_v59 }
 0x491   :  { %3234 = vmatprep.subr.mxu0 %v3465_v0  ;;  %v263_v2 = vpop.permute.xlu1 %262 }
 0x492   :  { %3235 = vmatpush3.msra.mxu0 %v3214_v46  ;;  %v266_v5 = vsel %vm265_vm2, %v2943_v61, %v263_v2 }
 0x493   :  { %3236 = vmatprep.subr.mxu0 %v3465_v0  ;;  %v827_v54 = vpop.permute.xlu0 %826 }
 0x494   :  { %3237 = vmatpush3.msra.mxu0 %v628_v48 }
 0x495   :  { %3239 = vmatmul.mubr.msk.f32.vlgmr.msra.gmra.mxu0 %vm281_vm3, %v266_v5  ;;  %3256 = vmatprep.subr.mxu0 %v3465_v0 }
 0x496   :  { %3260 = vmatprep.mubr.msk.f32.mxu0 %vm3466_vm1, %v3465_v0  ;;  %3257 = vmatpush3.msra.mxu0 %v3888_v11 }
 0x497   :  { %3258 = vmatprep.subr.mxu0 %v3465_v0 }
 0x498   :  { %3259 = vmatpush3.msra.mxu0 %v3895_v14 }
 0x499   :  { %3263 = vmatprep.subr.mxu0 %v3465_v0 }
 0x4a0   :  { %v1201_v61 = vpop.permute.xlu0 %1200 }
 0x4a1   :  { %vm1205_vm14 = vcmp.eq.s32.totalorder %v3702_v40, %v1201_v61 }
 0x555   :  { %v794_v24 = vpop.f32.mrf.mxu0 }
 0x556   :  { %v795_v37 = vadd.f32 %v794_v24, %v721_v52  ;;  %v2962_v24 = vld [vmem:[%s4390_s1 + $0x8] sm:$0xff] }
 0x557   :  { %v3240_v38 = vpop.f32.mrf.mxu0 }
 0x558   :  { %v805_v39 = vadd.f32 %v3944_v36, %v795_v37  ;;  %v837_v38 = vld [vmem:[%s4365_s20] sm:$0x1] }
 0x55a   :  { %v806_v42 = vmax.f32 %v805_v39, 0.0 }
 0x55c   :  { %v817_v43 = vsel %vm265_vm2, %v806_v42, 0.0  ;;  %1253 = vrot.lane.b32.xlu1 %v806_v42, %s4399_s10  ;;  %3261 = vmatmul.mubr.msk.f32.vlgmr.msra.gmra.mxu0 %vm265_vm2, %v806_v42 }
 0x55d   :  { %v818_v30 = vrot.slane %v817_v43, 4  ;;  %3267 = vmatprep.mubr.msk.f32.mxu0 %vm3466_vm1, %v3465_v0 }
 0x55f   :  { %v819_v46 = vadd.f32 %v818_v30, %v817_v43 }
 0x560   :  { %1213 = vperm.xlu1 %3462, %v1210_v44   ;;  %v4022_v44 = vld [vmem:[%s4366_s24] ss:$0 sm:$0xff] }
 0x561   :  { %v820_v48 = vrot.slane %v819_v46, 2 }
 0x563   :  { %v821_v49 = vadd.f32 %v820_v48, %v819_v46 }
 0x564   :  { %1216 = vperm.xlu1 %3462, %v1211_v47  }
 0x565   :  { %v822_v50 = vrot.slane %v821_v49, 1 }
 0x567   :  { %v823_v52 = vadd.f32 %v822_v50, %v821_v49 }
 0x568   :  { %1169 = vperm.xlu1 %3462, %v2965_v51  }
 0x569   :  { %v824_v53 = vmul.f32 0.125, %v823_v52 }
 0x56b   :  { %v829_v55 = vsel %vm265_vm2, %v824_v53, %v827_v54  ;;  %v2966_v53 = vld [vmem:[%s4392_s13 + $0x18] sm:$0xff] }
 0x56c   :  { %1338 = vrot.lane.b32.xlu1 %v3795_v25, %s4399_s10  ;;  %v830_v56 = vsel %vm281_vm3, %v829_v55, %v3722_v58 }
 0x56d   :  { %3254 = vmatmul.mubr.msk.f32.vlgmr.msra.gmra.mxu1 %vm461_vm10, %v830_v56  ;;  %v1204_v56 = vpop.permute.xlu0 %1203 }
 0x56e   :  { %3276 = vmatpush3.msra.mxu1 %v3626_v6  ;;  %3283 = vmatprep.mubr.msk.f32.mxu1 %vm3466_vm1, %v3465_v0  ;;  %v3980_v6 = vld [vmem:[%s4363_s23 + $0x8] sm:$0xff]  ;;  %vm1206_vm6 = vcmp.eq.s32.totalorder %v3702_v40, %v1204_v56 }
 0x56f   :  { %3277 = vmatprep.subr.mxu1 %v3465_v0  ;;  %3264 = vmatpush3.msra.mxu0 %v3980_v6  ;;  %v3006_v56 = vld [vmem:[%s4398_s0 + $0x28] sm:$0xff] }
 0x570   :  { %3278 = vmatpush3.msra.mxu1 %v3631_v7  ;;  %v3986_v7 = vld [vmem:[%s4363_s23] sm:$0xff]  ;;  %3265 = vmatprep.subr.mxu0 %v3465_v0 }
 0x571   :  { %3279 = vmatprep.subr.mxu1 %v3465_v0  ;;  %3266 = vmatpush3.msra.mxu0 %v3986_v7 }
 0x572   :  { %3280 = vmatpush3.msra.mxu1 %v3638_v8  ;;  %3270 = vmatprep.subr.mxu0 %v3465_v0 }
 0x573   :  { %3281 = vmatprep.subr.mxu1 %v3465_v0 }
 0x574   :  { %3282 = vmatpush3.msra.mxu1 %v3647_v9  ;;  %v3994_v9 = vld [vmem:[%s4364_s22] ss:$0 sm:$0xff] }
 0x575   :  { %3308 = vmatprep.subr.mxu1 %v3776_v12 }
 0x5ce   :  { %v1254_v8 = vpop.permute.xlu1 %1253 }
 0x5db   :  { %v1214_v58 = vpop.permute.xlu1 %1213 }
 0x5dc   :  { %vm1218_vm13 = vcmp.eq.s32.totalorder %v3702_v40, %v1214_v58 }
 0x5dd   :  { %vm1220_vm15 = vmor %vm1205_vm14, %vm1218_vm13 }
 0x5de   :  { %v2973_v37 = vsel %vm1220_vm15, 1.0, %v3465_v0 }
 0x5df   :  { %v1217_v54 = vpop.permute.xlu1 %1216 }
 0x5e0   :  { %vm1219_vm5 = vcmp.eq.s32.totalorder %v3702_v40, %v1217_v54  ;;  %v3005_v54 = vld [vmem:[%s4398_s0 + $0x20] sm:$0xff] }
 0x5e1   :  { %vm1221_vm7 = vmor %vm1206_vm6, %vm1219_vm5 }
 0x61c   :  { %v990_v25 = vpop.f32.mrf.mxu0 }
 0x61d   :  { %v991_v59 = vadd.f32 %v3994_v9, %v990_v25 }
 0x61e   :  { %v3262_v2 = vpop.f32.mrf.mxu0 }
 0x61f   :  { %v994_v5 = vmax.f32 %v991_v59, 0.0 }
 0x621   :  { %3268 = vmatmul.mubr.msk.f32.vlgmr.msra.gmra.mxu0 %vm265_vm2, %v994_v5 }
 0x622   :  { %3271 = vmatpush3.msra.mxu0 %v3605_v1  ;;  %3272 = vmatprep.mubr.msk.f32.mxu0 %vm3466_vm1, %v3465_v0 }
 0x625   :  { %3273 = vmatmul.mubr.msk.f32.vlgmr.msra.gmra.mxu0 %vm106_vm0, %v2962_v24 }
 0x626   :  { %3290 = vmatprep.mubr.msk.f32.mxu0 %vm265_vm2, %v2973_v37 }
 0x62d   :  { %v907_v39 = vpop.f32.mrf.mxu1 }
 0x62e   :  { %v4012_v41 = vadd.f32 %v907_v39, %v837_v38 }
 0x62f   :  { %v3255_v1 = vpop.f32.mrf.mxu1 }
 0x630   :  { %v911_v42 = vmax.f32 %v4012_v41, 0.0 }
 0x632   :  { %v1252_v43 = vrot.slane %v911_v42, %v3693_v33 }
 0x634   :  { %1345 = vrot.lane.b32.xlu1 %v1252_v43, %s3469_s28 }
 0x6e1   :  { %v1073_v30 = vpop.f32.mrf.mxu0 }
 0x6e2   :  { %v1074_v45 = vadd.f32 %v4022_v44, %v1073_v30 }
 0x6e3   :  { %v3269_v46 = vpop.f32.mrf.mxu0 }
 0x6e4   :  { %1078 = vst.msk [vmem:[%s4367_s25] sm:$0xff] %vm1077_vm4, %v1074_v45 }
 0x6e5   :  { %v1158_v47 = vpop.f32.mrf.mxu0 }
 0x6e6   :  { %v1159_v48 = vadd.f32 %v3653_v10, %v1158_v47 }
 0x6e7   :  { %v3274_v49 = vpop.f32.mrf.mxu0 }
 0x6e8   :  { %v1162_v50 = vmax.f32 %v1159_v48, 0.0 }
 0x6ea   :  { %v4031_v51 = vsel %vm265_vm2, %v1162_v50, %v1254_v8 }
 0x6eb   :  { %3284 = vmatmul.mubr.msk.f32.vlgmr.msra.gmra.mxu1 %vm281_vm3, %v4031_v51 }
 0x6ec   :  { %3309 = vmatpush3.msra.mxu1 %v3776_v12  ;;  %v1170_v12 = vpop.permute.xlu1 %1169 }
 0x6ed   :  { %3310 = vmatprep.subr.mxu1 %v3783_v13  ;;  %v1183_v55 = vmul.f32 %v3663_v17, %v1170_v12 }
 0x6ee   :  { %3311 = vmatpush3.msra.mxu1 %v3783_v13 }
 0x6ef   :  { %3315 = vmatprep.subr.mxu1 %v3465_v0  ;;  %v1192_v13 = vadd.f32 %v3672_v22, %v1183_v55 }
 0x6f0   :  { %v1339_v8 = vpop.permute.xlu1 %1338 }
 0x6f1   :  { %v1194_v58 = vmax.f32 %v1192_v13, 0.0  ;;  %v2976_v13 = vld [vmem:[%s4359_s3 + $0x1] ss:$0 sm:$0xff] }
 0x6f2   :  { %vm1232_vm9 = vcmp.eq.s32.totalorder %v3690_v32, %v2976_v13  ;;  %v2240_v13 = vld [vmem:[%s4393_s2 + $0x10] sm:$0xff] }
 0x6f3   :  { %v1348_v61 = vsel %vm265_vm2, %v1194_v58, %v1339_v8  ;;  %v2977_v8 = vsel %vm1232_vm9, 1.0, %v3465_v0 }
 0x6f4   :  { %v1346_v59 = vpop.permute.xlu1 %1345 }
 0x6f5   :  { %v1350_v2 = vsel %vm281_vm3, %v1348_v61, %v1346_v59 }
 0x7ab   :  { %v1330_v52 = vpop.f32.mrf.mxu1 }
 0x7ac   :  { %1335 = vrot.lane.b32.xlu0 %v1330_v52, %s3470_s11 }
 0x7ad   :  { %v3285_v10 = vpop.f32.mrf.mxu1 }
 0x7b0   :  { %1174 = vperm.xlu0 %3461, %v2966_v53  }
 0x7b4   :  { %1340 = vrot.lane.b32.xlu0 %v3797_v26, %s4399_s10  ;;  %v2974_v26 = vsel %vm1221_vm7, 1.0, %v3465_v0 }
 0x81e   :  { %v1336_v25 = vpop.permute.xlu0 %1335 }
 0x81f   :  { %3286 = vmatprep.subr.mxu0 %v1336_v25 }
 0x820   :  { %3287 = vmatpush3.msra.mxu0 %v1336_v25 }
 0x821   :  { %3288 = vmatprep.subr.mxu0 %v1330_v52 }
 0x822   :  { %3289 = vmatpush3.msra.mxu0 %v1330_v52 }
 0x823   :  { %3291 = vmatmul.mubr.msk.f32.vlgmr.msra.gmra.mxu0 %vm265_vm2, %v2974_v26  ;;  %3293 = vmatprep.subr.mxu0 %v3720_v57 }
 0x824   :  { %3305 = vmatprep.mubr.msk.f32.mxu0 %vm461_vm10, %v1350_v2  ;;  %3294 = vmatpush3.msra.mxu0 %v3720_v57 }
 0x825   :  { %3295 = vmatprep.subr.mxu0 %v3728_v60 }
 0x826   :  { %3296 = vmatpush3.msra.mxu0 %v3728_v60 }
 0x827   :  { %3297 = vmatprep.subr.mxu0 %v3739_v62 }
 0x828   :  { %3298 = vmatpush3.msra.mxu0 %v3739_v62 }
 0x829   :  { %3299 = vmatprep.subr.mxu0 %v3746_v63 }
 0x82a   :  { %3300 = vmatpush3.msra.mxu0 %v3746_v63 }
 0x82b   :  { %v1175_v5 = vpop.permute.xlu0 %1174  ;;  %3301 = vmatprep.subr.mxu0 %v3753_v3 }
 0x82c   :  { %v1184_v24 = vmul.f32 %v3663_v17, %v1175_v5  ;;  %3302 = vmatpush3.msra.mxu0 %v3753_v3  ;;  %v3007_v5 = vld [vmem:[%s4395_s29 + $0x20] sm:$0xff] }
 0x82d   :  { %3303 = vmatprep.subr.mxu0 %v3760_v4 }
 0x82e   :  { %v1193_v57 = vadd.f32 %v3672_v22, %v1184_v24  ;;  %3304 = vmatpush3.msra.mxu0 %v3760_v4 }
 0x82f   :  { %3330 = vmatprep.subr.mxu0 %v3465_v0  ;;  %v1341_v37 = vpop.permute.xlu0 %1340 }
 0x830   :  { %v1195_v62 = vmax.f32 %v1193_v57, 0.0 }
 0x832   :  { %v1349_v38 = vsel %vm265_vm2, %v1195_v62, %v1341_v37  ;;  %v2191_v62 = vadd.s32 8, %v3007_v5 }
 0x833   :  { %v1351_v63 = vsel %vm281_vm3, %v1349_v38, %v1346_v59  ;;  %v3008_v38 = vld [vmem:[%s4395_s29 + $0x28] sm:$0xff] }
 0x834   :  { %3306 = vmatmul.mubr.msk.f32.vlgmr.msra.gmra.mxu0 %vm461_vm10, %v1351_v63 }
 0x835   :  { %3338 = vmatprep.mubr.msk.f32.mxu0 %vm3466_vm1, %v3465_v0 }
 0x8e3   :  { %v3292_v17 = vpop.f32.mrf.mxu0 }
 0x8e5   :  { %v1430_v3 = vpop.f32.mrf.mxu0 }
 0x8f4   :  { %v3307_v39 = vpop.f32.mrf.mxu0 }
 0x8f5   :  { %v1517_v1 = vadd.f32 %v3307_v39, %v3292_v17  ;;  %v2192_v17 = vadd.s32 8, %v3008_v38 }
 0x8f6   :  { %v1511_v22 = vpop.f32.mrf.mxu0 }
 0x8f7   :  { %v1512_v43 = vadd.f32 %v1511_v22, %v1430_v3  ;;  %v1528_v4 = vadd.f32 %v3791_v19, %v1517_v1  ;;  %v3001_v22 = vld [vmem:[%s4392_s13 + $0x20] sm:$0xff] }
 0x8f9   :  { %v1527_v30 = vadd.f32 %v3791_v19, %v1512_v43  ;;  %v4078_v46 = vmax.f32 %v1528_v4, 0.0  ;;  %v1622_v19 = vsel %vm281_vm3, %v4031_v51, %v1346_v59 }
 0x8fb   :  { %v4076_v45 = vmax.f32 %v1527_v30, 0.0 }
 0x8fd   :  { %3312 = vmatprep.mubr.msk.f32.mxu1 %vm265_vm2, %v4076_v45 }
 0x8fe   :  { %3313 = vmatmul.mubr.msk.f32.vlgmr.msra.gmra.mxu1 %vm265_vm2, %v4078_v46 }
 0x8ff   :  { %3316 = vmatpush3.msra.mxu1 %v3802_v27  ;;  %3327 = vmatprep.mubr.msk.f32.mxu1 %vm3466_vm1, %v3465_v0 }
 0x900   :  { %3317 = vmatprep.subr.mxu1 %v3465_v0 }
 0x901   :  { %3318 = vmatpush3.msra.mxu1 %v3811_v28 }
 0x902   :  { %3319 = vmatprep.subr.mxu1 %v3465_v0 }
 0x903   :  { %3320 = vmatpush3.msra.mxu1 %v3820_v29 }
 0x904   :  { %3321 = vmatprep.subr.mxu1 %v3465_v0 }
 0x905   :  { %3322 = vmatpush3.msra.mxu1 %v3827_v31 }
 0x906   :  { %3323 = vmatprep.subr.mxu1 %v3465_v0 }
 0x907   :  { %3324 = vmatpush3.msra.mxu1 %v3834_v34 }
 0x908   :  { %3325 = vmatprep.subr.mxu1 %v3465_v0 }
 0x909   :  { %3326 = vmatpush3.msra.mxu1 %v3841_v35 }
 0x90a   :  { %3328 = vmatmul.mubr.msk.f32.vlgmr.msra.gmra.mxu1 %vm461_vm10, %v1622_v19  ;;  %3341 = vmatprep.subr.mxu1 %v3465_v0 }
 0x90b   :  { %3342 = vmatpush3.msra.mxu1 %v3902_v15  ;;  %3353 = vmatprep.mubr.msk.f32.mxu1 %vm3466_vm1, %v3465_v0  ;;  %v1784_v15 = vsel %vm265_vm2, %v4076_v45, 0.0 }
 0x90c   :  { %3343 = vmatprep.subr.mxu1 %v3465_v0 }
 0x90d   :  { %3344 = vmatpush3.msra.mxu1 %v3909_v16  ;;  %v1785_v16 = vsel %vm265_vm2, %v4078_v46, 0.0 }
 0x90e   :  { %3345 = vmatprep.subr.mxu1 %v3465_v0 }
 0x90f   :  { %3346 = vmatpush3.msra.mxu1 %v3916_v18  ;;  %v1786_v18 = vadd.f32 %v1785_v16, %v1784_v15 }
 0x910   :  { %3347 = vmatprep.subr.mxu1 %v3465_v0 }
 0x911   :  { %3348 = vmatpush3.msra.mxu1 %v3922_v20  ;;  %v1787_v47 = vrot.slane %v1786_v18, 4 }
 0x912   :  { %3349 = vmatprep.subr.mxu1 %v3465_v0 }
 0x913   :  { %3350 = vmatpush3.msra.mxu1 %v3928_v21  ;;  %v1788_v48 = vadd.f32 %v1787_v47, %v1786_v18  ;;  %v2979_v21 = vld [vmem:[%s4358_s4 + $0x1] ss:$0 sm:$0xff] }
 0x914   :  { %3351 = vmatprep.subr.mxu1 %v3465_v0  ;;  %vm1241_vm8 = vcmp.eq.s32.totalorder %v3690_v32, %v2979_v21 }
 0x915   :  { %3352 = vmatpush3.msra.mxu1 %v3935_v23  ;;  %v1789_v20 = vrot.slane %v1788_v48, 2  ;;  %v2980_v10 = vsel %vm1241_vm8, 1.0, %v3465_v0 }
 0x916   :  { %3375 = vmatprep.subr.mxu1 %v3465_v0 }
 0x917   :  { %v1790_v49 = vadd.f32 %v1789_v20, %v1788_v48 }
 0x919   :  { %v1791_v50 = vrot.slane %v1790_v49, 1 }
 0x91b   :  { %v1792_v51 = vadd.f32 %v1791_v50, %v1790_v49 }
 0x91d   :  { %v1793_v53 = vmul.f32 0.0625, %v1792_v51 }
 0x9be   :  { %v3314_v23 = vpop.f32.mrf.mxu1 }
 0x9bf   :  { %1618 = vrot.lane.b32.xlu0 %v3314_v23, %s3470_s11 }
 0x9c0   :  { %v1605_v52 = vpop.f32.mrf.mxu1 }
 0x9c1   :  { %1616 = vrot.lane.b32.xlu1 %v1605_v52, %s3470_s11 }
 0x9c3   :  { %1245 = vrot.lane.b32.xlu0 %v2980_v10, %s4399_s10 }
 0x9c5   :  { %1803 = vrot.lane.b32.xlu1 %v1793_v53, %s4399_s10 }
 0x9c7   :  { %1807 = vrot.lane.b32.xlu0 %v911_v42, %s3469_s28 }
 0x9ca   :  { %v1698_v12 = vpop.f32.mrf.mxu1 }
 0x9cb   :  { %2181 = vperm.xlu0 %3461, %v3005_v54  }
 0x9cc   :  { %v3329_v55 = vpop.f32.mrf.mxu1 }
 0x9cf   :  { %2184 = vperm.xlu0 %3461, %v3006_v56   ;;  %v2241_v56 = vld [vmem:[%s4393_s2 + $0x18] sm:$0xff] }
 0xa31   :  { %v1619_v41 = vpop.permute.xlu0 %1618 }
 0xa32   :  { %3331 = vmatpush3.msra.mxu0 %v1619_v41  ;;  %v2238_v41 = vld [vmem:[%s4393_s2] sm:$0xff] }
 0xa33   :  { %3332 = vmatprep.subr.mxu0 %v3465_v0  ;;  %v1617_v42 = vpop.permute.xlu1 %1616 }
 0xa34   :  { %3333 = vmatpush3.msra.mxu0 %v1617_v42 }
 0xa35   :  { %v1246_v58 = vpop.permute.xlu0 %1245  ;;  %3334 = vmatprep.subr.mxu0 %v3465_v0 }
 0xa36   :  { %v1248_v25 = vsel %vm265_vm2, %v2977_v8, %v1246_v58  ;;  %3335 = vmatpush3.msra.mxu0 %v3314_v23  ;;  %v2998_v23 = vld [vmem:[%s4390_s1 + $0x10] sm:$0xff] }
 0xa37   :  { %3336 = vmatprep.subr.mxu0 %v3465_v0  ;;  %v1804_v30 = vpop.permute.xlu1 %1803 }
 0xa38   :  { %3337 = vmatpush3.msra.mxu0 %v1605_v52  ;;  %v1818_v52 = vld [vmem:[%s4365_s20] sm:$0x1] }
 0xa39   :  { %3339 = vmatmul.mubr.msk.f32.vlgmr.msra.gmra.mxu0 %vm281_vm3, %v1248_v25  ;;  %3356 = vmatprep.subr.mxu0 %v3465_v0  ;;  %v1808_v19 = vpop.permute.xlu0 %1807  ;;  %v2999_v25 = vld [vmem:[%s4400_s12] ss:$0 sm:$0xff] }
 0xa3a   :  { %3357 = vmatpush3.msra.mxu0 %v3888_v11  ;;  %3360 = vmatprep.mubr.msk.f32.mxu0 %vm3466_vm1, %v3465_v0 }
 0xa3b   :  { %3358 = vmatprep.subr.mxu0 %v3465_v0 }
 0xa3c   :  { %3359 = vmatpush3.msra.mxu0 %v3895_v14 }
 0xa3d   :  { %3363 = vmatprep.subr.mxu0 %v3465_v0 }
 0xa46   :  { %v2182_v49 = vpop.permute.xlu0 %2181 }
 0xa47   :  { %vm2186_vm12 = vcmp.eq.s32.totalorder %v3702_v40, %v2182_v49 }
 0xaf9   :  { %v1771_v59 = vpop.f32.mrf.mxu0 }
 0xafa   :  { %v1772_v26 = vadd.f32 %v1771_v59, %v1698_v12 }
 0xafb   :  { %v3340_v61 = vpop.f32.mrf.mxu0 }
 0xafc   :  { %v1782_v2 = vadd.f32 %v3944_v36, %v1772_v26 }
 0xafe   :  { %v1783_v24 = vmax.f32 %v1782_v2, 0.0 }
 0xb00   :  { %v1794_v57 = vsel %vm265_vm2, %v1783_v24, 0.0  ;;  %2234 = vrot.lane.b32.xlu1 %v1783_v24, %s4399_s10  ;;  %3361 = vmatmul.mubr.msk.f32.vlgmr.msra.gmra.mxu0 %vm265_vm2, %v1783_v24 }
 0xb01   :  { %v1795_v37 = vrot.slane %v1794_v57, 4  ;;  %3364 = vmatpush3.msra.mxu0 %v3980_v6  ;;  %3367 = vmatprep.mubr.msk.f32.mxu0 %vm3466_vm1, %v3465_v0 }
 0xb02   :  { %3365 = vmatprep.subr.mxu0 %v3465_v0 }
 0xb03   :  { %v1796_v63 = vadd.f32 %v1795_v37, %v1794_v57  ;;  %3366 = vmatpush3.msra.mxu0 %v3986_v7 }
 0xb04   :  { %2194 = vperm.xlu1 %3462, %v2191_v62   ;;  %3370 = vmatprep.subr.mxu0 %v3465_v0  ;;  %v3002_v62 = vld [vmem:[%s4392_s13 + $0x28] sm:$0xff] }
 0xb05   :  { %v1797_v3 = vrot.slane %v1796_v63, 2 }
 0xb07   :  { %v1798_v39 = vadd.f32 %v1797_v3, %v1796_v63  ;;  %v3463_v63 = vld [vmem:[%s4396_s26] ss:$0 sm:$0xff]  ;;  %v2185_v3 = vpop.permute.xlu0 %2184 }
 0xb08   :  { %2197 = vperm.xlu1 %3462, %v2192_v17   ;;  %vm2187_vm14 = vcmp.eq.s32.totalorder %v3702_v40, %v2185_v3 }
 0xb09   :  { %v1799_v1 = vrot.slane %v1798_v39, 1 }
 0xb0b   :  { %v1800_v43 = vadd.f32 %v1799_v1, %v1798_v39  ;;  %v3464_v39 = vld [vmem:[%s4397_s5] ss:$0 sm:$0xff] }
 0xb0c   :  { %2150 = vperm.xlu1 %3462, %v3001_v22  }
 0xb0d   :  { %v1801_v4 = vmul.f32 0.125, %v1800_v43 }
 0xb0f   :  { %v1810_v15 = vsel %vm265_vm2, %v1801_v4, %v1804_v30  ;;  %v2338_v30 = vld [vmem:[%s4354_s14 + $0x28] sm:$0xff] }
 0xb10   :  { %2319 = vrot.lane.b32.xlu1 %v4076_v45, %s4399_s10  ;;  %v1811_v16 = vsel %vm281_vm3, %v1810_v15, %v1808_v19  ;;  %v2062_v45 = vld [vmem:[%s4389_s7] sm:$0xff] }
 0xb11   :  { %3354 = vmatmul.mubr.msk.f32.vlgmr.msra.gmra.mxu1 %vm461_vm10, %v1811_v16  ;;  %v2336_v16 = vld [vmem:[%s4354_s14 + $0x18] sm:$0xff] }
 0xb12   :  { %3383 = vmatprep.mubr.msk.f32.mxu1 %vm3466_vm1, %v3465_v0  ;;  %3376 = vmatpush3.msra.mxu1 %v2241_v56 }
 0xb13   :  { %3377 = vmatprep.subr.mxu1 %v3465_v0 }
 0xb14   :  { %3378 = vmatpush3.msra.mxu1 %v2240_v13 }
 0xb15   :  { %3379 = vmatprep.subr.mxu1 %v3465_v0 }
 0xb72   :  { %v2235_v18 = vpop.permute.xlu1 %2234 }
 0xb7f   :  { %v2195_v47 = vpop.permute.xlu1 %2194 }
 0xb80   :  { %vm2199_vm11 = vcmp.eq.s32.totalorder %v3702_v40, %v2195_v47  ;;  %v2334_v47 = vld [vmem:[%s4354_s14 + $0x8] sm:$0xff] }
 0xb81   :  { %vm2201_vm13 = vmor %vm2186_vm12, %vm2199_vm11 }
 0xb82   :  { %v3009_v51 = vsel %vm2201_vm13, 1.0, %v3465_v0 }
 0xb83   :  { %v2198_v37 = vpop.permute.xlu1 %2197 }
 0xb87   :  { %v2151_v38 = vpop.permute.xlu1 %2150 }
 0xb88   :  { %v2164_v17 = vmul.f32 %v3463_v63, %v2151_v38 }
 0xb8a   :  { %v2173_v1 = vadd.f32 %v3464_v39, %v2164_v17 }
 0xb8b   :  { %v2320_v22 = vpop.permute.xlu1 %2319 }
 0xb8c   :  { %v2175_v43 = vmax.f32 %v2173_v1, 0.0 }
 0xb8e   :  { %v2329_v15 = vsel %vm265_vm2, %v2175_v43, %v2320_v22 }
 0xbc0   :  { %v1971_v48 = vpop.f32.mrf.mxu0 }
 0xbc1   :  { %v1972_v20 = vadd.f32 %v3994_v9, %v1971_v48  ;;  %v2333_v48 = vld [vmem:[%s4354_s14] sm:$0xff] }
 0xbc2   :  { %v3362_v21 = vpop.f32.mrf.mxu0 }
 0xbc3   :  { %v1975_v50 = vmax.f32 %v1972_v20, 0.0 }
 0xbc5   :  { %3368 = vmatmul.mubr.msk.f32.vlgmr.msra.gmra.mxu0 %vm265_vm2, %v1975_v50 }
 0xbc6   :  { %3371 = vmatpush3.msra.mxu0 %v2062_v45  ;;  %3372 = vmatprep.mubr.msk.f32.mxu0 %vm3466_vm1, %v3465_v0 }
 0xbc9   :  { %3373 = vmatmul.mubr.msk.f32.vlgmr.msra.gmra.mxu0 %vm106_vm0, %v2998_v23  ;;  %vm2200_vm0 = vcmp.eq.s32.totalorder %v3702_v40, %v2198_v37 }
 0xbca   :  { %3390 = vmatprep.mubr.msk.f32.mxu0 %vm265_vm2, %v3009_v51  ;;  %vm2202_vm15 = vmor %vm2187_vm14, %vm2200_vm0  ;;  %v2513_v51 = vld [vmem:[%s4355_s16 + $0x8] sm:$0xff] }
 0xbcb   :  { %v3010_v19 = vsel %vm2202_vm15, 1.0, %v3465_v0 }
 0xbd1   :  { %v1888_v10 = vpop.f32.mrf.mxu1 }
 0xbd2   :  { %v1889_v53 = vadd.f32 %v1888_v10, %v1818_v52  ;;  %v2512_v52 = vld [vmem:[%s4355_s16] sm:$0xff] }
 0xbd3   :  { %v3355_v54 = vpop.f32.mrf.mxu1 }
 0xbd4   :  { %v1892_v12 = vmax.f32 %v1889_v53, 0.0 }
 0xbd6   :  { %v2233_v55 = vrot.slane %v1892_v12, %v3693_v33  ;;  %v2239_v33 = vld [vmem:[%s4393_s2 + $0x8] sm:$0xff] }
 0xbd7   :  { %3380 = vmatpush3.msra.mxu1 %v2239_v33 }
 0xbd8   :  { %2326 = vrot.lane.b32.xlu1 %v2233_v55, %s3469_s28  ;;  %3381 = vmatprep.subr.mxu1 %v3465_v0  ;;  %v3022_v55 = vld [vmem:[%s4356_s15] ss:$0 sm:$0xff] }
 0xbd9   :  { %3382 = vmatpush3.msra.mxu1 %v2238_v41 }
 0xbda   :  { %3408 = vmatprep.subr.mxu1 %v2513_v51 }
 0xc4a   :  { %v4242_v4 = vpop.permute.xlu1 %2326 }
 0xc4b   :  { %v2331_v40 = vsel %vm281_vm3, %v2329_v15, %v4242_v4 }
 0xc85   :  { %v2054_v42 = vpop.f32.mrf.mxu0 }
 0xc86   :  { %v2055_v8 = vadd.f32 %v4022_v44, %v2054_v42 }
 0xc87   :  { %v3369_v58 = vpop.f32.mrf.mxu0 }
 0xc88   :  { %2997 = vst.msk [vmem:[%s4367_s25 + $0x8] sm:$0xff] %vm1077_vm4, %v2055_v8 }
 0xc89   :  { %v2139_v59 = vpop.f32.mrf.mxu0 }
 0xc8a   :  { %v2140_v26 = vadd.f32 %v2999_v25, %v2139_v59 }
 0xc8b   :  { %v3374_v61 = vpop.f32.mrf.mxu0 }
 0xc8c   :  { %v2143_v2 = vmax.f32 %v2140_v26, 0.0 }
 0xc8e   :  { %v4224_v5 = vsel %vm265_vm2, %v2143_v2, %v2235_v18  ;;  %v2335_v18 = vld [vmem:[%s4354_s14 + $0x10] sm:$0xff] }
 0xc8f   :  { %3384 = vmatmul.mubr.msk.f32.vlgmr.msra.gmra.mxu1 %vm281_vm3, %v4224_v5 }
 0xc90   :  { %3409 = vmatpush3.msra.mxu1 %v2513_v51 }
 0xc91   :  { %3410 = vmatprep.subr.mxu1 %v2512_v52 }
 0xc92   :  { %3411 = vmatpush3.msra.mxu1 %v2512_v52 }
 0xc93   :  { %3415 = vmatprep.subr.mxu1 %v3465_v0 }
 0xd4f   :  { %v2311_v24 = vpop.f32.mrf.mxu1 }
 0xd50   :  { %2316 = vrot.lane.b32.xlu0 %v2311_v24, %s3470_s11 }
 0xd51   :  { %v3385_v57 = vpop.f32.mrf.mxu1 }
 0xd54   :  { %2155 = vperm.xlu0 %3461, %v3002_v62  }
 0xd58   :  { %2321 = vrot.lane.b32.xlu0 %v4078_v46, %s4399_s10 }
 0xdc2   :  { %v2317_v46 = vpop.permute.xlu0 %2316 }
 0xdc3   :  { %3386 = vmatprep.subr.mxu0 %v2317_v46 }
 0xdc4   :  { %3387 = vmatpush3.msra.mxu0 %v2317_v46 }
 0xdc5   :  { %3388 = vmatprep.subr.mxu0 %v2311_v24 }
 0xdc6   :  { %3389 = vmatpush3.msra.mxu0 %v2311_v24 }
 0xdc7   :  { %3391 = vmatmul.mubr.msk.f32.vlgmr.msra.gmra.mxu0 %vm265_vm2, %v3010_v19  ;;  %3393 = vmatprep.subr.mxu0 %v2338_v30 }
 0xdc8   :  { %3405 = vmatprep.mubr.msk.f32.mxu0 %vm461_vm10, %v2331_v40  ;;  %3394 = vmatpush3.msra.mxu0 %v2338_v30 }
 0xdc9   :  { %3395 = vmatprep.subr.mxu0 %v3728_v60 }
 0xdca   :  { %3396 = vmatpush3.msra.mxu0 %v3728_v60 }
 0xdcb   :  { %3397 = vmatprep.subr.mxu0 %v2336_v16 }
 0xdcc   :  { %3398 = vmatpush3.msra.mxu0 %v2336_v16 }
 0xdcd   :  { %3399 = vmatprep.subr.mxu0 %v2335_v18 }
 0xdce   :  { %3400 = vmatpush3.msra.mxu0 %v2335_v18 }
 0xdcf   :  { %v2156_v20 = vpop.permute.xlu0 %2155  ;;  %3401 = vmatprep.subr.mxu0 %v2334_v47 }
 0xdd0   :  { %v2165_v49 = vmul.f32 %v3463_v63, %v2156_v20  ;;  %3402 = vmatpush3.msra.mxu0 %v2334_v47 }
 0xdd1   :  { %3403 = vmatprep.subr.mxu0 %v2333_v48 }
 0xdd2   :  { %v2174_v60 = vadd.f32 %v3464_v39, %v2165_v49  ;;  %3404 = vmatpush3.msra.mxu0 %v2333_v48 }
 0xdd3   :  { %3430 = vmatprep.subr.mxu0 %v3465_v0  ;;  %v2322_v50 = vpop.permute.xlu0 %2321 }
 0xdd4   :  { %v2176_v21 = vmax.f32 %v2174_v60, 0.0 }
 0xdd6   :  { %v2330_v45 = vsel %vm265_vm2, %v2176_v21, %v2322_v50 }
 0xdd7   :  { %v2332_v23 = vsel %vm281_vm3, %v2330_v45, %v4242_v4 }
 0xdd8   :  { %3406 = vmatmul.mubr.msk.f32.vlgmr.msra.gmra.mxu0 %vm461_vm10, %v2332_v23 }
 0xdd9   :  { %3438 = vmatprep.mubr.msk.f32.mxu0 %vm3466_vm1, %v3465_v0 }
 0xe87   :  { %v3392_v10 = vpop.f32.mrf.mxu0 }
 0xe89   :  { %v2411_v53 = vpop.f32.mrf.mxu0 }
 0xe98   :  { %v3407_v54 = vpop.f32.mrf.mxu0 }
 0xe99   :  { %v2498_v12 = vadd.f32 %v3407_v54, %v3392_v10 }
 0xe9a   :  { %v2492_v56 = vpop.f32.mrf.mxu0 }
 0xe9b   :  { %v2493_v13 = vadd.f32 %v2492_v56, %v2411_v53  ;;  %v2509_v33 = vadd.f32 %v3022_v55, %v2498_v12 }
 0xe9d   :  { %v2508_v41 = vadd.f32 %v3022_v55, %v2493_v13  ;;  %v2511_v8 = vmax.f32 %v2509_v33, 0.0 }
 0xe9f   :  { %v2510_v42 = vmax.f32 %v2508_v41, 0.0 }
 0xea1   :  { %3412 = vmatprep.mubr.msk.f32.mxu1 %vm265_vm2, %v2510_v42 }
 0xea2   :  { %3413 = vmatmul.mubr.msk.f32.vlgmr.msra.gmra.mxu1 %vm265_vm2, %v2511_v8 }
 0xea3   :  { %3416 = vmatpush3.msra.mxu1 %v3802_v27  ;;  %3427 = vmatprep.mubr.msk.f32.mxu1 %vm3466_vm1, %v3465_v0  ;;  %v2603_v27 = vsel %vm281_vm3, %v4224_v5, %v4242_v4 }
 0xea4   :  { %3417 = vmatprep.subr.mxu1 %v3465_v0 }
 0xea5   :  { %3418 = vmatpush3.msra.mxu1 %v3811_v28  ;;  %v3015_v28 = vld [vmem:[%s4358_s4 + $0x2] ss:$0 sm:$0xff] }
 0xea6   :  { %3419 = vmatprep.subr.mxu1 %v3465_v0  ;;  %vm2222_vm5 = vcmp.eq.s32.totalorder %v3690_v32, %v3015_v28 }
 0xea7   :  { %3420 = vmatpush3.msra.mxu1 %v3820_v29 }
 0xea8   :  { %3421 = vmatprep.subr.mxu1 %v3465_v0 }
 0xea9   :  { %3422 = vmatpush3.msra.mxu1 %v3827_v31 }
 0xeaa   :  { %3423 = vmatprep.subr.mxu1 %v3465_v0 }
 0xeab   :  { %3424 = vmatpush3.msra.mxu1 %v3834_v34  ;;  %v3016_v34 = vsel %vm2222_vm5, 1.0, %v3465_v0 }
 0xeac   :  { %3425 = vmatprep.subr.mxu1 %v3465_v0 }
 0xead   :  { %3426 = vmatpush3.msra.mxu1 %v3841_v35 }
 0xeae   :  { %3428 = vmatmul.mubr.msk.f32.vlgmr.msra.gmra.mxu1 %vm461_vm10, %v2603_v27  ;;  %3441 = vmatprep.subr.mxu1 %v3465_v0 }
 0xeaf   :  { %3442 = vmatpush3.msra.mxu1 %v3888_v11  ;;  %3445 = vmatprep.mubr.msk.f32.mxu1 %vm3466_vm1, %v3465_v0 }
 0xeb0   :  { %3443 = vmatprep.subr.mxu1 %v3465_v0 }
 0xeb1   :  { %3444 = vmatpush3.msra.mxu1 %v3895_v14  ;;  %v3012_v14 = vld [vmem:[%s4359_s3 + $0x2] ss:$0 sm:$0xff] }
 0xeb2   :  { %vm2213_vm10 = vcmp.eq.s32.totalorder %v3690_v32, %v3012_v14 }
 0xeb3   :  { %v3013_v59 = vsel %vm2213_vm10, 1.0, %v3465_v0 }
 0xf62   :  { %v3414_v29 = vpop.f32.mrf.mxu1 }
 0xf63   :  { %2599 = vrot.lane.b32.xlu0 %v3414_v29, %s3470_s11 }
 0xf64   :  { %v2586_v31 = vpop.f32.mrf.mxu1 }
 0xf65   :  { %2597 = vrot.lane.b32.xlu1 %v2586_v31, %s3470_s11 }
 0xf67   :  { %2226 = vrot.lane.b32.xlu0 %v3016_v34, %s4399_s10 }
 0xf6e   :  { %v2679_v35 = vpop.f32.mrf.mxu1 }
 0xf70   :  { %v3429_v11 = vpop.f32.mrf.mxu1 }
 0xfd5   :  { %v2600_v58 = vpop.permute.xlu0 %2599 }
 0xfd6   :  { %3431 = vmatpush3.msra.mxu0 %v2600_v58 }
 0xfd7   :  { %3432 = vmatprep.subr.mxu0 %v3465_v0  ;;  %v2598_v25 = vpop.permute.xlu1 %2597 }
 0xfd8   :  { %3433 = vmatpush3.msra.mxu0 %v2598_v25 }
 0xfd9   :  { %3434 = vmatprep.subr.mxu0 %v3465_v0  ;;  %v2227_v26 = vpop.permute.xlu0 %2226 }
 0xfda   :  { %3435 = vmatpush3.msra.mxu0 %v3414_v29  ;;  %v2229_v61 = vsel %vm265_vm2, %v3013_v59, %v2227_v26 }
 0xfdb   :  { %3436 = vmatprep.subr.mxu0 %v3465_v0 }
 0xfdc   :  { %3437 = vmatpush3.msra.mxu0 %v2586_v31 }
 0xfdd   :  { %3439 = vmatmul.mubr.msk.f32.vlgmr.msra.gmra.mxu0 %vm281_vm3, %v2229_v61  ;;  %3448 = vmatprep.subr.mxu0 %v3465_v0 }
 0xfde   :  { %3449 = vmatpush3.msra.mxu0 %v3980_v6  ;;  %3452 = vmatprep.mubr.msk.f32.mxu0 %vm3466_vm1, %v3465_v0 }
 0xfdf   :  { %3450 = vmatprep.subr.mxu0 %v3465_v0 }
 0xfe0   :  { %3451 = vmatpush3.msra.mxu0 %v3986_v7 }
0x109d   :  { %v2752_v32 = vpop.f32.mrf.mxu0 }
0x109e   :  { %v2753_v2 = vadd.f32 %v2752_v32, %v2679_v35 }
0x109f   :  { %v3440_v5 = vpop.f32.mrf.mxu0 }
0x10a0   :  { %v2763_v24 = vadd.f32 %v3944_v36, %v2753_v2 }
0x10a2   :  { %v2764_v57 = vmax.f32 %v2763_v24, 0.0 }
0x10a4   :  { %3446 = vmatmul.mubr.msk.f32.vlgmr.msra.gmra.mxu1 %vm265_vm2, %v2764_v57 }
0x1164   :  { %v2843_v62 = vpop.f32.mrf.mxu1 }
0x1165   :  { %v2844_v37 = vadd.f32 %v3994_v9, %v2843_v62 }
0x1166   :  { %v3447_v38 = vpop.f32.mrf.mxu1 }
0x1167   :  { %v2847_v6 = vmax.f32 %v2844_v37, 0.0 }
0x1169   :  { %3453 = vmatmul.mubr.msk.f32.vlgmr.msra.gmra.mxu0 %vm265_vm2, %v2847_v6 }
0x1229   :  { %v2926_v63 = vpop.f32.mrf.mxu0 }
0x122a   :  { %v2927_v0 = vadd.f32 %v4022_v44, %v2926_v63 }
0x122b   :  { %v3454_v17 = vpop.f32.mrf.mxu0 }
0x122c   :  { %3032 = vst.msk [vmem:[%s4367_s25 + $0x10] sm:$0xff] %vm1077_vm4, %v2927_v0 }

</bundles_post_ra>
